<compile_context>
chip_gen: v7x
topology: tpu7x:2x2x1
jax: 0.10.0
libtpu: 0.0.40
codegen_flags: <defaults>
</compile_context>

<pallas_src>
import functools
import math

import jax
import jax.numpy as jnp
from jax.experimental import pallas as pl
from jax.experimental.pallas import tpu as pltpu


# ----------------------------- packed-vector row indices (within the vec block) ---------
_A2W_H0, _A2W_H1, _A2_OUT = 0, 1, 2            # W0@a2_0, W1@a2_1, a2_out  (for c2 dots)
_LN_G_H0, _LN_B_H0, _LN_G_H1, _LN_B_H1 = 3, 4, 5, 6
_LN_G_OUT, _LN_B_OUT = 7, 8
_FC_B, _GAT_LN_G, _GAT_LN_B = 9, 10, 11
_BQ, _BK, _BV, _BO, _BG = 12, 13, 14, 15, 16
_NUM_VEC = 17

# Weight-slab row layout (all offsets are multiples of H=32 -> 8-aligned sublanes):
#   [0H:1H)  heads block  [W0 | W1 | W0@a1_0 | W1@a1_1]   cols 0 : 2H+2
#   [1H:2H)  kv block     [wk | wv]                       cols 0 : 2H
#   [2H:3H)  qg block     [wq*scale | wg_word]            cols 0 : 2H
#   [3H:4H)  fc_W                                         cols 0 : H
#   [4H:5H)  wo  (attn out proj)                          cols 0 : H
#   [5H:6H)  wg_att (gate half applied to att)            cols 0 : H
#   [6H:8H)  wout_ext = [Wout | Wout@a1_out]              cols 0 : H+1
#   [8H:8H+17) packed bias / LN / a2 vectors              cols 0 : H


# ----------------------------- in-kernel helpers -----------------------------

def _erf(x):
    # Abramowitz & Stegun 7.1.26 rational approximation, |err| <= 1.5e-7.
    # TODO(synk): Mosaic has no native erf; this matches torch's exact GELU to ~f32 precision.
    p = 0.3275911
    a1, a2, a3, a4, a5 = 0.254829592, -0.284496736, 1.421413741, -1.453152027, 1.061405429
    sgn = jnp.where(x >= 0, 1.0, -1.0)
    ax = jnp.abs(x)
    t = 1.0 / (1.0 + p * ax)
    poly = ((((a5 * t + a4) * t + a3) * t + a2) * t + a1) * t
    return sgn * (1.0 - poly * jnp.exp(-ax * ax))


def _gelu(x):
    return 0.5 * x * (1.0 + _erf(x * 0.7071067811865476))


def _layer_norm(x, gamma, beta, eps=1e-5):
    mu = jnp.mean(x, axis=-1, keepdims=True)
    var = jnp.mean(jnp.square(x - mu), axis=-1, keepdims=True)
    return (x - mu) * jax.lax.rsqrt(var + eps) * gamma + beta


# ----------------------------- fully fused forward kernel -----------------------------

def _graph_fused_kernel(node_ref, adjb_ref, word_ref, xmask_ref, w_ref, o_ref,
                        *, H, alpha, use_bf16):
    f32 = jnp.float32
    h = node_ref[0]                    # (Rn, H)   node embeddings for this step (residual)
    adjb = adjb_ref[0]                 # (Rn, Rn)  additive adjacency bias (0 / -9e15)
    w = word_ref[0]                    # (Rw, H)   word embeddings
    xmask = xmask_ref[0]               # (Rw, Rn)  additive key-padding / cross-batch bias

    def dot(a, b):                     # standard (M,K)@(K,N)
        if use_bf16:
            a, b = a.astype(jnp.bfloat16), b.astype(jnp.bfloat16)
        return jnp.dot(a, b, preferred_element_type=f32)

    def dot_tc(a, b):                  # contract last dims: (M,K)x(N,K) -> (M,N)
        if use_bf16:
            a, b = a.astype(jnp.bfloat16), b.astype(jnp.bfloat16)
        return jax.lax.dot_general(a, b, (((1,), (1,)), ((), ())),
                                   preferred_element_type=f32)

    vecs = w_ref[8 * H:8 * H + _NUM_VEC, 0:H]          # (17, H) packed vector table

    def vrow(i):                                        # (1, H) static slice
        return vecs[i:i + 1, :]

    def gat_softmax_agg(Wh, c1, c2row):
        # e[i,j] = leakyrelu(c1[i] + c2[j]) + adj_bias; softmax rows; aggregate.
        e = c1 + c2row                                  # (Rn, Rn)
        e = jnp.where(e > 0, e, alpha * e) + adjb
        p = jnp.exp(e - jnp.max(e, axis=-1, keepdims=True))
        attn = p * pl.reciprocal(jnp.sum(p, axis=-1, keepdims=True), approx=True)
        return dot(attn, Wh)                            # (Rn, Fout)

    # ---- both GAT head projections + folded a1 coefficient columns: ONE matmul ----
    Whc = dot(h, w_ref[0:H, 0:2 * H + 2])               # (Rn, 2H+2)
    wout = w_ref[6 * H:8 * H, 0:H + 1]                  # (2H, H+1) = [Wout | Wout@a1_out]
    acc = jnp.zeros((h.shape[0], H + 1), f32)
    for i in range(2):                                  # static unroll over the 2 heads
        Wh_i = Whc[:, i * H:(i + 1) * H]
        c1_i = Whc[:, 2 * H + i:2 * H + i + 1]          # folded: (h@W_i)@a1_i  (Rn,1)
        c2_i = dot_tc(vrow(_A2W_H0 + i), h)             # h@(W_i@a2_i) as (1,Rn); depends
        hp = gat_softmax_agg(Wh_i, c1_i, c2_i)          #   only on h -> off critical path
        hp = _layer_norm(hp, vrow(_LN_G_H0 + 2 * i), vrow(_LN_B_H0 + 2 * i))
        xi = _gelu(hp)                                  # concat=True head output
        # out_att projection of the (virtual) concat done per half -> no in-kernel concat
        acc = acc + dot(xi, wout[i * H:(i + 1) * H, :])

    # ---- out_att layer (concat=False); c1_out folded into the wout matmul ----
    Wh_o = acc[:, 0:H]
    c1_o = acc[:, H:H + 1]
    c2_o = dot_tc(vrow(_A2_OUT), Wh_o)                  # (1, Rn)
    hp_o = gat_softmax_agg(Wh_o, c1_o, c2_o)
    hp_o = _layer_norm(hp_o, vrow(_LN_G_OUT), vrow(_LN_B_OUT))

    # ---- GAT tail: gelu -> fc -> residual -> layernorm ----
    y = dot(_gelu(hp_o), w_ref[3 * H:4 * H, 0:H]) + vrow(_FC_B)
    g_emb = _layer_norm(y + h, vrow(_GAT_LN_G), vrow(_GAT_LN_B))       # (Rn, H)

    # ---- single-head cross attention (1/sqrt(H) pre-folded into wq/bq) + sigmoid gate ----
    qg = dot(w, w_ref[2 * H:3 * H, 0:2 * H])            # (Rw, 2H) = [q_scaled | w@wg_word]
    q = qg[:, 0:H] + vrow(_BQ)
    kv = dot(g_emb, w_ref[H:2 * H, 0:2 * H])            # (Rn, 2H) = [k_raw | v_raw]
    k = kv[:, 0:H] + vrow(_BK)
    v = kv[:, H:2 * H] + vrow(_BV)
    s = dot_tc(q, k) + xmask                            # (Rw, Rn)
    p = jnp.exp(s - jnp.max(s, axis=-1, keepdims=True))
    attn = p * pl.reciprocal(jnp.sum(p, axis=-1, keepdims=True), approx=True)
    att = dot(attn, v)                                  # (Rw, H)
    att = dot(att, w_ref[4 * H:5 * H, 0:H]) + vrow(_BO)             # out_proj
    pre = qg[:, H:2 * H] + dot(att, w_ref[5 * H:6 * H, 0:H]) + vrow(_BG)
    gate = 1.0 / (1.0 + jnp.exp(-pre))                  # exact sigmoid (review correctness note)
    o_ref[0] = (1.0 - gate) * w + gate * att


# ----------------------------- wrapper -----------------------------

def _default_batch_per_step(B):
    # v7-class chips have 2 TensorCores/chip: keep 1 batch per grid step so the "parallel"
    # grid axis shards across both cores.  Single-TC v5e/v6e: flatten the whole batch into
    # one grid step (no serial grid overhead, doubled sublane occupancy).
    try:
        kind = jax.devices()[0].device_kind.lower()
    except Exception:
        kind = ""
    if "v7" in kind or "7x" in kind:
        return 1
    return B


def graph_fused_forward(wslab, word_embeds, node_embeds, got_nodes, adj_matrix,
                        *, batch_per_step=None, use_bf16_matmul=False):
    B, S, H = word_embeds.shape
    N = node_embeds.shape[1]
    G = _default_batch_per_step(B) if batch_per_step is None else batch_per_step
    assert B % G == 0
    T = B // G                                       # grid steps
    Rn, Rw = G * N, G * S

    node = node_embeds.astype(jnp.float32).reshape(T, Rn, H)
    word = word_embeds.astype(jnp.float32).reshape(T, Rw, H)

    # Block-diagonal additive adjacency bias over the G batches packed into one step.
    # Adding -9e15 is bit-identical (post f32 rounding) to torch's where(adj>0, e, -9e15).
    eye_g = jnp.eye(G, dtype=jnp.bool_)
    adj_ok = (adj_matrix > 0).reshape(T, G, N, N)
    conn = eye_g[None, :, None, :, None] & adj_ok[:, :, :, None, :]      # (T,G,N,G,N)
    adjb = jnp.where(conn, 0.0, -9e15).reshape(T, Rn, Rn).astype(jnp.float32)

    # Key-padding + cross-batch additive bias for the cross attention.
    # NOTE: -1e30 (not -inf) keeps an all-padded batch finite (uniform attention) where
    # torch nn.MultiheadAttention would produce NaN.
    padded = (jnp.sum(got_nodes, axis=-1) == 0).reshape(T, G, N)
    ok = eye_g[None, :, None, :, None] & (~padded)[:, None, None, :, :]  # (T,G,1,G,N)
    ok = jnp.broadcast_to(ok, (T, G, S, G, N))
    xmask = jnp.where(ok, 0.0, -1e30).reshape(T, Rw, Rn).astype(jnp.float32)

    kernel = functools.partial(_graph_fused_kernel, H=H, alpha=0.02,  # GAT module default alpha
                               use_bf16=use_bf16_matmul)
    out = pl.pallas_call(
        kernel,
        out_shape=jax.ShapeDtypeStruct((T, Rw, H), jnp.float32),
        grid=(T,),
        in_specs=[
            pl.BlockSpec((1, Rn, H), lambda t: (t, 0, 0)),     # node embeds
            pl.BlockSpec((1, Rn, Rn), lambda t: (t, 0, 0)),    # adjacency additive bias
            pl.BlockSpec((1, Rw, H), lambda t: (t, 0, 0)),     # word embeds
            pl.BlockSpec((1, Rw, Rn), lambda t: (t, 0, 0)),    # key-padding additive bias
            pl.BlockSpec(wslab.shape, lambda t: (0, 0)),       # single packed weight slab
        ],
        out_specs=pl.BlockSpec((1, Rw, H), lambda t: (t, 0, 0)),
        compiler_params=pltpu.CompilerParams(dimension_semantics=("parallel",)),
    )(node, adjb, word, xmask, wslab)
    return out.reshape(B, S, H)


# ----------------------------- one-time parameter packing -----------------------------

def pack_params(p, H):
    """Fold 1/sqrt(H) into wq/bq, fold a1-vectors into projection columns, precompute W@a2
    rows, and pack everything into one f32 slab of shape (8H+17 padded, 2H+2)."""
    scale = 1.0 / math.sqrt(H)
    wc = 2 * H + 2

    def padcols(x):
        return jnp.pad(x, ((0, 0), (0, wc - x.shape[1])))

    W0, W1 = p["heads"][0]["W"], p["heads"][1]["W"]
    a0, a1 = p["heads"][0]["a"], p["heads"][1]["a"]
    a1_0, a2_0 = a0[:H, 0], a0[H:, 0]
    a1_1, a2_1 = a1[:H, 0], a1[H:, 0]
    oa = p["out_att"]
    Wout = oa["W"]
    a1_o, a2_o = oa["a"][:H, 0], oa["a"][H:, 0]

    blk_heads = jnp.concatenate([W0, W1, (W0 @ a1_0)[:, None], (W1 @ a1_1)[:, None]], axis=1)
    blk_kv = padcols(jnp.concatenate([p["wk"], p["wv"]], axis=1))
    blk_qg = padcols(jnp.concatenate([p["wq"] * scale, p["wg"][:H]], axis=1))
    blk_fc = padcols(p["fc_W"])
    blk_wo = padcols(p["wo"])
    blk_wg = padcols(p["wg"][H:])
    blk_wout = padcols(jnp.concatenate([Wout, (Wout @ a1_o)[:, None]], axis=1))

    vec_rows = [W0 @ a2_0, W1 @ a2_1, a2_o,
                p["heads"][0]["g"], p["heads"][0]["b"], p["heads"][1]["g"], p["heads"][1]["b"],
                oa["g"], oa["b"],
                p["fc_b"], p["gat_ln_g"], p["gat_ln_b"],
                p["bq"] * scale, p["bk"], p["bv"], p["bo"], p["bg"]]
    vecs = padcols(jnp.stack(vec_rows))
    assert vecs.shape[0] == _NUM_VEC

    slab = jnp.concatenate([blk_heads, blk_kv, blk_qg, blk_fc, blk_wo, blk_wg, blk_wout, vecs],
                           axis=0)
    pad = (-slab.shape[0]) % 8
    slab = jnp.pad(slab, ((0, pad), (0, 0)))
    return slab.astype(jnp.float32)


# ----------------------------- deterministic synthetic parameters -----------------------------

def init_params(key, H):
    ks = jax.random.split(key, 20)

    def nrm(k, shape, s):
        return (s * jax.random.normal(k, shape)).astype(jnp.float32)

    params = {"heads": []}
    for i in range(2):
        params["heads"].append(dict(
            W=nrm(ks[2 * i], (H, H), 0.2),
            a=nrm(ks[2 * i + 1], (2 * H, 1), 0.2),
            g=jnp.ones((H,), jnp.float32),
            b=jnp.zeros((H,), jnp.float32)))
    params["out_att"] = dict(W=nrm(ks[4], (2 * H, H), 0.2), a=nrm(ks[5], (2 * H, 1), 0.2),
                             g=jnp.ones((H,), jnp.float32), b=jnp.zeros((H,), jnp.float32))
    params["fc_W"] = nrm(ks[6], (H, H), 0.2)
    params["fc_b"] = nrm(ks[7], (H,), 0.1)
    params["gat_ln_g"] = jnp.ones((H,), jnp.float32)
    params["gat_ln_b"] = jnp.zeros((H,), jnp.float32)
    params["wq"], params["bq"] = nrm(ks[8], (H, H), 0.2), nrm(ks[9], (H,), 0.1)
    params["wk"], params["bk"] = nrm(ks[10], (H, H), 0.2), nrm(ks[11], (H,), 0.1)
    params["wv"], params["bv"] = nrm(ks[12], (H, H), 0.2), nrm(ks[13], (H,), 0.1)
    params["wo"], params["bo"] = nrm(ks[14], (H, H), 0.2), nrm(ks[15], (H,), 0.1)
    params["wg"] = nrm(ks[16], (2 * H, H), 0.01)                # gate weight: std=0.01
    params["bg"] = jnp.full((H,), -10.0, jnp.float32)           # gate bias: -10.0
    return params


# ----------------------------- pure-JAX reference (for validation) -----------------------------

def _reference_forward(p, word, node, got, adj, H):
    alpha, scale = 0.02, 1.0 / math.sqrt(H)
    outs = []
    for b in range(word.shape[0]):
        h, A, w = node[b], adj[b], word[b]

        def gat(x, W, a, g, bb):
            Wh = x @ W
            e = Wh @ a[:H] + (Wh @ a[H:]).T
            e = jnp.where(e > 0, e, alpha * e)
            e = jnp.where(A > 0, e, -9e15)
            hp = jax.nn.softmax(e, axis=-1) @ Wh
            mu = hp.mean(-1, keepdims=True)
            var = ((hp - mu) ** 2).mean(-1, keepdims=True)
            return (hp - mu) * jax.lax.rsqrt(var + 1e-5) * g + bb

        h0 = p["heads"][0]; h1 = p["heads"][1]; oa = p["out_att"]
        x0 = jax.nn.gelu(gat(h, h0["W"], h0["a"], h0["g"], h0["b"]), approximate=False)
        x1 = jax.nn.gelu(gat(h, h1["W"], h1["a"], h1["g"], h1["b"]), approximate=False)
        xc = jnp.concatenate([x0, x1], axis=-1)
        xo = jax.nn.gelu(gat(xc, oa["W"], oa["a"], oa["g"], oa["b"]), approximate=False)
        y = xo @ p["fc_W"] + p["fc_b"] + h
        mu = y.mean(-1, keepdims=True)
        var = ((y - mu) ** 2).mean(-1, keepdims=True)
        g_emb = (y - mu) * jax.lax.rsqrt(var + 1e-5) * p["gat_ln_g"] + p["gat_ln_b"]

        q = (w @ p["wq"] + p["bq"]) * scale
        k = g_emb @ p["wk"] + p["bk"]
        v = g_emb @ p["wv"] + p["bv"]
        bias = jnp.where(jnp.sum(got[b], -1) == 0, -1e30, 0.0)[None, :]
        att = jax.nn.softmax(q @ k.T + bias, axis=-1) @ v
        att = att @ p["wo"] + p["bo"]
        gate = jax.nn.sigmoid(jnp.concatenate([w, att], axis=-1) @ p["wg"] + p["bg"])
        outs.append((1.0 - gate) * w + gate * att)
    return jnp.stack(outs)


if __name__ == "__main__":
    B, S, N, H, K = 2, 8, 8, 32, 4
    key = jax.random.PRNGKey(0)
    kp, kw, kn, kg, ka = jax.random.split(key, 5)

    params = init_params(kp, H)
    wslab = pack_params(params, H)                              # one-time constant transform

    word_embeds = jax.random.normal(kw, (B, S, H), jnp.float32)
    node_embeds = jax.random.normal(kn, (B, N, H), jnp.float32)
    got_nodes = jax.random.randint(kg, (B, N, K), 1, 5, dtype=jnp.int32)
    got_nodes = got_nodes.at[0, N - 1].set(0)                   # pad (mask) one node in batch 0
    adj_matrix = (jax.random.uniform(ka, (B, N, N)) > 0.5).astype(jnp.int32)
    adj_matrix = jnp.maximum(adj_matrix, jnp.eye(N, dtype=jnp.int32)[None])  # self-loops

    fwd = jax.jit(graph_fused_forward)
    out = fwd(wslab, word_embeds, node_embeds, got_nodes, adj_matrix)
    jax.block_until_ready(out)
    assert out.shape == (B, S, H)
    assert bool(jnp.all(jnp.isfinite(out)))

    with jax.default_matmul_precision("float32"):
        ref = _reference_forward(params, word_embeds, node_embeds, got_nodes, adj_matrix, H)
    err = float(jnp.max(jnp.abs(out - ref)))
    assert err < 1e-5, f"kernel vs reference max abs err {err}"
    print("KERNEL_OK")
</pallas_src>

<mosaic_0001>
module attributes {stable_mosaic.version = 11 : i64} {
  func.func @_graph_fused_kernel(%arg0: i32, %arg1: memref<1x16x32xf32, #tpu.memory_space<vmem>>, %arg2: memref<1x16x16xf32, #tpu.memory_space<vmem>>, %arg3: memref<1x16x32xf32, #tpu.memory_space<vmem>>, %arg4: memref<1x16x16xf32, #tpu.memory_space<vmem>>, %arg5: memref<280x66xf32, #tpu.memory_space<vmem>>, %arg6: memref<1x16x32xf32, #tpu.memory_space<vmem>>) attributes {dimension_semantics = [#tpu.dimension_semantics<parallel>], iteration_bounds = array<i64: 1>, scalar_prefetch = 0 : i64, scratch_operands = 0 : i64, tpu.core_type = #tpu.core_type<tc>, window_params = [{transform_indices = @transform_0, window_bounds = array<i64: 1, 16, 32>}, {transform_indices = @transform_1, window_bounds = array<i64: 1, 16, 16>}, {transform_indices = @transform_2, window_bounds = array<i64: 1, 16, 32>}, {transform_indices = @transform_3, window_bounds = array<i64: 1, 16, 16>}, {pipeline_mode = #tpu.pipeline_mode<synchronous>, transform_indices = @transform_4, window_bounds = array<i64: 280, 66>}, {transform_indices = @transform_5, window_bounds = array<i64: 1, 16, 32>}]} {
    %c0 = arith.constant 0 : index
    %c0_0 = arith.constant 0 : index
    %c0_1 = arith.constant 0 : index
    %0 = vector.load %arg1[%c0, %c0_0, %c0_1] : memref<1x16x32xf32, #tpu.memory_space<vmem>>, vector<1x16x32xf32>
    %1 = vector.shape_cast %0 : vector<1x16x32xf32> to vector<16x32xf32>
    %c0_2 = arith.constant 0 : index
    %c0_3 = arith.constant 0 : index
    %c0_4 = arith.constant 0 : index
    %2 = vector.load %arg2[%c0_2, %c0_3, %c0_4] : memref<1x16x16xf32, #tpu.memory_space<vmem>>, vector<1x16x16xf32>
    %3 = vector.shape_cast %2 : vector<1x16x16xf32> to vector<16x16xf32>
    %c0_5 = arith.constant 0 : index
    %c0_6 = arith.constant 0 : index
    %c0_7 = arith.constant 0 : index
    %4 = vector.load %arg3[%c0_5, %c0_6, %c0_7] : memref<1x16x32xf32, #tpu.memory_space<vmem>>, vector<1x16x32xf32>
    %5 = vector.shape_cast %4 : vector<1x16x32xf32> to vector<16x32xf32>
    %c0_8 = arith.constant 0 : index
    %c0_9 = arith.constant 0 : index
    %c0_10 = arith.constant 0 : index
    %6 = vector.load %arg4[%c0_8, %c0_9, %c0_10] : memref<1x16x16xf32, #tpu.memory_space<vmem>>, vector<1x16x16xf32>
    %7 = vector.shape_cast %6 : vector<1x16x16xf32> to vector<16x16xf32>
    %c256 = arith.constant 256 : index
    %c0_11 = arith.constant 0 : index
    %8 = vector.load %arg5[%c256, %c0_11] : memref<280x66xf32, #tpu.memory_space<vmem>>, vector<17x32xf32>
    %c0_12 = arith.constant 0 : index
    %c0_13 = arith.constant 0 : index
    %9 = vector.load %arg5[%c0_12, %c0_13] : memref<280x66xf32, #tpu.memory_space<vmem>>, vector<32x66xf32>
    %cst = arith.constant dense<0.000000e+00> : vector<16x66xf32>
    %10 = tpu.matmul %1, %9, %cst {dimension_numbers = #tpu.dot_dimension_numbers<[1], [0], [0], [1], [0, 0, 1, 1], [], []>} : vector<16x32xf32>, vector<32x66xf32>, vector<16x66xf32> -> vector<16x66xf32>
    %c192 = arith.constant 192 : index
    %c0_14 = arith.constant 0 : index
    %11 = vector.load %arg5[%c192, %c0_14] : memref<280x66xf32, #tpu.memory_space<vmem>>, vector<64x33xf32>
    %cst_15 = arith.constant 0.000000e+00 : f32
    %12 = vector.broadcast %cst_15 : f32 to vector<16x33xf32>
    %13 = vector.extract_strided_slice %10 {offsets = [0, 0], sizes = [16, 32], strides = [1, 1]} : vector<16x66xf32> to vector<16x32xf32>
    %14 = vector.extract_strided_slice %10 {offsets = [0, 64], sizes = [16, 1], strides = [1, 1]} : vector<16x66xf32> to vector<16x1xf32>
    %15 = vector.extract_strided_slice %8 {offsets = [0, 0], sizes = [1, 32], strides = [1, 1]} : vector<17x32xf32> to vector<1x32xf32>
    %cst_16 = arith.constant dense<0.000000e+00> : vector<1x16xf32>
    %16 = tpu.matmul %15, %1, %cst_16 {dimension_numbers = #tpu.dot_dimension_numbers<[1], [1], [0], [0], [0, 0, 1, 0], [], []>} : vector<1x32xf32>, vector<16x32xf32>, vector<1x16xf32> -> vector<1x16xf32>
    %17 = vector.broadcast %14 : vector<16x1xf32> to vector<16x16xf32>
    %18 = vector.broadcast %16 : vector<1x16xf32> to vector<16x16xf32>
    %19 = arith.addf %17, %18 : vector<16x16xf32>
    %cst_17 = arith.constant 0.000000e+00 : f32
    %20 = vector.broadcast %cst_17 : f32 to vector<16x16xf32>
    %21 = arith.cmpf ogt, %19, %20 : vector<16x16xf32>
    %cst_18 = arith.constant 2.000000e-02 : f32
    %22 = vector.broadcast %cst_18 : f32 to vector<16x16xf32>
    %23 = arith.mulf %22, %19 : vector<16x16xf32>
    %24 = arith.select %21, %19, %23 : vector<16x16xi1>, vector<16x16xf32>
    %25 = arith.addf %24, %3 : vector<16x16xf32>
    %cst_19 = arith.constant dense<0xFF800000> : vector<16xf32>
    %26 = vector.multi_reduction <maximumf>, %25, %cst_19 [1] : vector<16x16xf32> to vector<16xf32>
    %27 = vector.shape_cast %26 : vector<16xf32> to vector<16x1xf32>
    %28 = vector.broadcast %27 : vector<16x1xf32> to vector<16x16xf32>
    %29 = arith.subf %25, %28 : vector<16x16xf32>
    %30 = math.exp %29 : vector<16x16xf32>
    %cst_20 = arith.constant dense<0.000000e+00> : vector<16xf32>
    %31 = vector.multi_reduction <add>, %30, %cst_20 [1] : vector<16x16xf32> to vector<16xf32>
    %32 = vector.shape_cast %31 : vector<16xf32> to vector<16x1xf32>
    %33 = tpu.reciprocal %32 {approx = true} : vector<16x1xf32> -> vector<16x1xf32>
    %34 = vector.broadcast %33 : vector<16x1xf32> to vector<16x16xf32>
    %35 = arith.mulf %30, %34 : vector<16x16xf32>
    %cst_21 = arith.constant dense<0.000000e+00> : vector<16x32xf32>
    %36 = tpu.matmul %35, %13, %cst_21 {dimension_numbers = #tpu.dot_dimension_numbers<[1], [0], [0], [1], [0, 0, 1, 1], [], []>} : vector<16x16xf32>, vector<16x32xf32>, vector<16x32xf32> -> vector<16x32xf32>
    %37 = vector.extract_strided_slice %8 {offsets = [3, 0], sizes = [1, 32], strides = [1, 1]} : vector<17x32xf32> to vector<1x32xf32>
    %38 = vector.extract_strided_slice %8 {offsets = [4, 0], sizes = [1, 32], strides = [1, 1]} : vector<17x32xf32> to vector<1x32xf32>
    %cst_22 = arith.constant dense<0.000000e+00> : vector<16xf32>
    %39 = vector.multi_reduction <add>, %36, %cst_22 [1] : vector<16x32xf32> to vector<16xf32>
    %40 = vector.shape_cast %39 : vector<16xf32> to vector<16x1xf32>
    %cst_23 = arith.constant 3.200000e+01 : f32
    %41 = vector.broadcast %cst_23 : f32 to vector<16x1xf32>
    %42 = arith.divf %40, %41 : vector<16x1xf32>
    %43 = vector.broadcast %42 : vector<16x1xf32> to vector<16x32xf32>
    %44 = arith.subf %36, %43 : vector<16x32xf32>
    %45 = arith.mulf %44, %44 : vector<16x32xf32>
    %cst_24 = arith.constant dense<0.000000e+00> : vector<16xf32>
    %46 = vector.multi_reduction <add>, %45, %cst_24 [1] : vector<16x32xf32> to vector<16xf32>
    %47 = vector.shape_cast %46 : vector<16xf32> to vector<16x1xf32>
    %cst_25 = arith.constant 3.200000e+01 : f32
    %48 = vector.broadcast %cst_25 : f32 to vector<16x1xf32>
    %49 = arith.divf %47, %48 : vector<16x1xf32>
    %50 = vector.broadcast %42 : vector<16x1xf32> to vector<16x32xf32>
    %51 = arith.subf %36, %50 : vector<16x32xf32>
    %cst_26 = arith.constant 9.99999974E-6 : f32
    %52 = vector.broadcast %cst_26 : f32 to vector<16x1xf32>
    %53 = arith.addf %49, %52 : vector<16x1xf32>
    %54 = math.rsqrt %53 : vector<16x1xf32>
    %55 = vector.broadcast %54 : vector<16x1xf32> to vector<16x32xf32>
    %56 = arith.mulf %51, %55 : vector<16x32xf32>
    %57 = vector.broadcast %37 : vector<1x32xf32> to vector<16x32xf32>
    %58 = arith.mulf %56, %57 : vector<16x32xf32>
    %59 = vector.broadcast %38 : vector<1x32xf32> to vector<16x32xf32>
    %60 = arith.addf %58, %59 : vector<16x32xf32>
    %cst_27 = arith.constant 5.000000e-01 : f32
    %61 = vector.broadcast %cst_27 : f32 to vector<16x32xf32>
    %62 = arith.mulf %61, %60 : vector<16x32xf32>
    %cst_28 = arith.constant 0.707106769 : f32
    %63 = vector.broadcast %cst_28 : f32 to vector<16x32xf32>
    %64 = arith.mulf %60, %63 : vector<16x32xf32>
    %cst_29 = arith.constant 0.000000e+00 : f32
    %65 = vector.broadcast %cst_29 : f32 to vector<16x32xf32>
    %66 = arith.cmpf oge, %64, %65 : vector<16x32xf32>
    %cst_30 = arith.constant 1.000000e+00 : f32
    %cst_31 = arith.constant -1.000000e+00 : f32
    %67 = vector.broadcast %cst_30 : f32 to vector<16x32xf32>
    %68 = vector.broadcast %cst_31 : f32 to vector<16x32xf32>
    %69 = arith.select %66, %67, %68 : vector<16x32xi1>, vector<16x32xf32>
    %70 = math.absf %64 : vector<16x32xf32>
    %cst_32 = arith.constant 0.327591091 : f32
    %71 = vector.broadcast %cst_32 : f32 to vector<16x32xf32>
    %72 = arith.mulf %71, %70 : vector<16x32xf32>
    %cst_33 = arith.constant 1.000000e+00 : f32
    %73 = vector.broadcast %cst_33 : f32 to vector<16x32xf32>
    %74 = arith.addf %73, %72 : vector<16x32xf32>
    %cst_34 = arith.constant 1.000000e+00 : f32
    %75 = vector.broadcast %cst_34 : f32 to vector<16x32xf32>
    %76 = arith.divf %75, %74 : vector<16x32xf32>
    %cst_35 = arith.constant 1.06140542 : f32
    %77 = vector.broadcast %cst_35 : f32 to vector<16x32xf32>
    %78 = arith.mulf %77, %76 : vector<16x32xf32>
    %cst_36 = arith.constant -1.45315206 : f32
    %79 = vector.broadcast %cst_36 : f32 to vector<16x32xf32>
    %80 = arith.addf %78, %79 : vector<16x32xf32>
    %81 = arith.mulf %80, %76 : vector<16x32xf32>
    %cst_37 = arith.constant 1.42141378 : f32
    %82 = vector.broadcast %cst_37 : f32 to vector<16x32xf32>
    %83 = arith.addf %81, %82 : vector<16x32xf32>
    %84 = arith.mulf %83, %76 : vector<16x32xf32>
    %cst_38 = arith.constant -0.284496725 : f32
    %85 = vector.broadcast %cst_38 : f32 to vector<16x32xf32>
    %86 = arith.addf %84, %85 : vector<16x32xf32>
    %87 = arith.mulf %86, %76 : vector<16x32xf32>
    %cst_39 = arith.constant 0.254829586 : f32
    %88 = vector.broadcast %cst_39 : f32 to vector<16x32xf32>
    %89 = arith.addf %87, %88 : vector<16x32xf32>
    %90 = arith.mulf %89, %76 : vector<16x32xf32>
    %cst_40 = arith.constant 0.000000e+00 : f32
    %91 = vector.broadcast %cst_40 : f32 to vector<16x32xf32>
    %92 = arith.subf %91, %70 : vector<16x32xf32>
    %93 = arith.mulf %92, %70 : vector<16x32xf32>
    %94 = math.exp %93 : vector<16x32xf32>
    %95 = arith.mulf %90, %94 : vector<16x32xf32>
    %cst_41 = arith.constant 1.000000e+00 : f32
    %96 = vector.broadcast %cst_41 : f32 to vector<16x32xf32>
    %97 = arith.subf %96, %95 : vector<16x32xf32>
    %98 = arith.mulf %69, %97 : vector<16x32xf32>
    %cst_42 = arith.constant 1.000000e+00 : f32
    %99 = vector.broadcast %cst_42 : f32 to vector<16x32xf32>
    %100 = arith.addf %99, %98 : vector<16x32xf32>
    %101 = arith.mulf %62, %100 : vector<16x32xf32>
    %102 = vector.extract_strided_slice %11 {offsets = [0, 0], sizes = [32, 33], strides = [1, 1]} : vector<64x33xf32> to vector<32x33xf32>
    %cst_43 = arith.constant dense<0.000000e+00> : vector<16x33xf32>
    %103 = tpu.matmul %101, %102, %cst_43 {dimension_numbers = #tpu.dot_dimension_numbers<[1], [0], [0], [1], [0, 0, 1, 1], [], []>} : vector<16x32xf32>, vector<32x33xf32>, vector<16x33xf32> -> vector<16x33xf32>
    %104 = arith.addf %12, %103 : vector<16x33xf32>
    %105 = vector.extract_strided_slice %10 {offsets = [0, 32], sizes = [16, 32], strides = [1, 1]} : vector<16x66xf32> to vector<16x32xf32>
    %106 = vector.extract_strided_slice %10 {offsets = [0, 65], sizes = [16, 1], strides = [1, 1]} : vector<16x66xf32> to vector<16x1xf32>
    %107 = vector.extract_strided_slice %8 {offsets = [1, 0], sizes = [1, 32], strides = [1, 1]} : vector<17x32xf32> to vector<1x32xf32>
    %cst_44 = arith.constant dense<0.000000e+00> : vector<1x16xf32>
    %108 = tpu.matmul %107, %1, %cst_44 {dimension_numbers = #tpu.dot_dimension_numbers<[1], [1], [0], [0], [0, 0, 1, 0], [], []>} : vector<1x32xf32>, vector<16x32xf32>, vector<1x16xf32> -> vector<1x16xf32>
    %109 = vector.broadcast %106 : vector<16x1xf32> to vector<16x16xf32>
    %110 = vector.broadcast %108 : vector<1x16xf32> to vector<16x16xf32>
    %111 = arith.addf %109, %110 : vector<16x16xf32>
    %cst_45 = arith.constant 0.000000e+00 : f32
    %112 = vector.broadcast %cst_45 : f32 to vector<16x16xf32>
    %113 = arith.cmpf ogt, %111, %112 : vector<16x16xf32>
    %cst_46 = arith.constant 2.000000e-02 : f32
    %114 = vector.broadcast %cst_46 : f32 to vector<16x16xf32>
    %115 = arith.mulf %114, %111 : vector<16x16xf32>
    %116 = arith.select %113, %111, %115 : vector<16x16xi1>, vector<16x16xf32>
    %117 = arith.addf %116, %3 : vector<16x16xf32>
    %cst_47 = arith.constant dense<0xFF800000> : vector<16xf32>
    %118 = vector.multi_reduction <maximumf>, %117, %cst_47 [1] : vector<16x16xf32> to vector<16xf32>
    %119 = vector.shape_cast %118 : vector<16xf32> to vector<16x1xf32>
    %120 = vector.broadcast %119 : vector<16x1xf32> to vector<16x16xf32>
    %121 = arith.subf %117, %120 : vector<16x16xf32>
    %122 = math.exp %121 : vector<16x16xf32>
    %cst_48 = arith.constant dense<0.000000e+00> : vector<16xf32>
    %123 = vector.multi_reduction <add>, %122, %cst_48 [1] : vector<16x16xf32> to vector<16xf32>
    %124 = vector.shape_cast %123 : vector<16xf32> to vector<16x1xf32>
    %125 = tpu.reciprocal %124 {approx = true} : vector<16x1xf32> -> vector<16x1xf32>
    %126 = vector.broadcast %125 : vector<16x1xf32> to vector<16x16xf32>
    %127 = arith.mulf %122, %126 : vector<16x16xf32>
    %cst_49 = arith.constant dense<0.000000e+00> : vector<16x32xf32>
    %128 = tpu.matmul %127, %105, %cst_49 {dimension_numbers = #tpu.dot_dimension_numbers<[1], [0], [0], [1], [0, 0, 1, 1], [], []>} : vector<16x16xf32>, vector<16x32xf32>, vector<16x32xf32> -> vector<16x32xf32>
    %129 = vector.extract_strided_slice %8 {offsets = [5, 0], sizes = [1, 32], strides = [1, 1]} : vector<17x32xf32> to vector<1x32xf32>
    %130 = vector.extract_strided_slice %8 {offsets = [6, 0], sizes = [1, 32], strides = [1, 1]} : vector<17x32xf32> to vector<1x32xf32>
    %cst_50 = arith.constant dense<0.000000e+00> : vector<16xf32>
    %131 = vector.multi_reduction <add>, %128, %cst_50 [1] : vector<16x32xf32> to vector<16xf32>
    %132 = vector.shape_cast %131 : vector<16xf32> to vector<16x1xf32>
    %cst_51 = arith.constant 3.200000e+01 : f32
    %133 = vector.broadcast %cst_51 : f32 to vector<16x1xf32>
    %134 = arith.divf %132, %133 : vector<16x1xf32>
    %135 = vector.broadcast %134 : vector<16x1xf32> to vector<16x32xf32>
    %136 = arith.subf %128, %135 : vector<16x32xf32>
    %137 = arith.mulf %136, %136 : vector<16x32xf32>
    %cst_52 = arith.constant dense<0.000000e+00> : vector<16xf32>
    %138 = vector.multi_reduction <add>, %137, %cst_52 [1] : vector<16x32xf32> to vector<16xf32>
    %139 = vector.shape_cast %138 : vector<16xf32> to vector<16x1xf32>
    %cst_53 = arith.constant 3.200000e+01 : f32
    %140 = vector.broadcast %cst_53 : f32 to vector<16x1xf32>
    %141 = arith.divf %139, %140 : vector<16x1xf32>
    %142 = vector.broadcast %134 : vector<16x1xf32> to vector<16x32xf32>
    %143 = arith.subf %128, %142 : vector<16x32xf32>
    %cst_54 = arith.constant 9.99999974E-6 : f32
    %144 = vector.broadcast %cst_54 : f32 to vector<16x1xf32>
    %145 = arith.addf %141, %144 : vector<16x1xf32>
    %146 = math.rsqrt %145 : vector<16x1xf32>
    %147 = vector.broadcast %146 : vector<16x1xf32> to vector<16x32xf32>
    %148 = arith.mulf %143, %147 : vector<16x32xf32>
    %149 = vector.broadcast %129 : vector<1x32xf32> to vector<16x32xf32>
    %150 = arith.mulf %148, %149 : vector<16x32xf32>
    %151 = vector.broadcast %130 : vector<1x32xf32> to vector<16x32xf32>
    %152 = arith.addf %150, %151 : vector<16x32xf32>
    %cst_55 = arith.constant 5.000000e-01 : f32
    %153 = vector.broadcast %cst_55 : f32 to vector<16x32xf32>
    %154 = arith.mulf %153, %152 : vector<16x32xf32>
    %cst_56 = arith.constant 0.707106769 : f32
    %155 = vector.broadcast %cst_56 : f32 to vector<16x32xf32>
    %156 = arith.mulf %152, %155 : vector<16x32xf32>
    %cst_57 = arith.constant 0.000000e+00 : f32
    %157 = vector.broadcast %cst_57 : f32 to vector<16x32xf32>
    %158 = arith.cmpf oge, %156, %157 : vector<16x32xf32>
    %cst_58 = arith.constant 1.000000e+00 : f32
    %cst_59 = arith.constant -1.000000e+00 : f32
    %159 = vector.broadcast %cst_58 : f32 to vector<16x32xf32>
    %160 = vector.broadcast %cst_59 : f32 to vector<16x32xf32>
    %161 = arith.select %158, %159, %160 : vector<16x32xi1>, vector<16x32xf32>
    %162 = math.absf %156 : vector<16x32xf32>
    %cst_60 = arith.constant 0.327591091 : f32
    %163 = vector.broadcast %cst_60 : f32 to vector<16x32xf32>
    %164 = arith.mulf %163, %162 : vector<16x32xf32>
    %cst_61 = arith.constant 1.000000e+00 : f32
    %165 = vector.broadcast %cst_61 : f32 to vector<16x32xf32>
    %166 = arith.addf %165, %164 : vector<16x32xf32>
    %cst_62 = arith.constant 1.000000e+00 : f32
    %167 = vector.broadcast %cst_62 : f32 to vector<16x32xf32>
    %168 = arith.divf %167, %166 : vector<16x32xf32>
    %cst_63 = arith.constant 1.06140542 : f32
    %169 = vector.broadcast %cst_63 : f32 to vector<16x32xf32>
    %170 = arith.mulf %169, %168 : vector<16x32xf32>
    %cst_64 = arith.constant -1.45315206 : f32
    %171 = vector.broadcast %cst_64 : f32 to vector<16x32xf32>
    %172 = arith.addf %170, %171 : vector<16x32xf32>
    %173 = arith.mulf %172, %168 : vector<16x32xf32>
    %cst_65 = arith.constant 1.42141378 : f32
    %174 = vector.broadcast %cst_65 : f32 to vector<16x32xf32>
    %175 = arith.addf %173, %174 : vector<16x32xf32>
    %176 = arith.mulf %175, %168 : vector<16x32xf32>
    %cst_66 = arith.constant -0.284496725 : f32
    %177 = vector.broadcast %cst_66 : f32 to vector<16x32xf32>
    %178 = arith.addf %176, %177 : vector<16x32xf32>
    %179 = arith.mulf %178, %168 : vector<16x32xf32>
    %cst_67 = arith.constant 0.254829586 : f32
    %180 = vector.broadcast %cst_67 : f32 to vector<16x32xf32>
    %181 = arith.addf %179, %180 : vector<16x32xf32>
    %182 = arith.mulf %181, %168 : vector<16x32xf32>
    %cst_68 = arith.constant 0.000000e+00 : f32
    %183 = vector.broadcast %cst_68 : f32 to vector<16x32xf32>
    %184 = arith.subf %183, %162 : vector<16x32xf32>
    %185 = arith.mulf %184, %162 : vector<16x32xf32>
    %186 = math.exp %185 : vector<16x32xf32>
    %187 = arith.mulf %182, %186 : vector<16x32xf32>
    %cst_69 = arith.constant 1.000000e+00 : f32
    %188 = vector.broadcast %cst_69 : f32 to vector<16x32xf32>
    %189 = arith.subf %188, %187 : vector<16x32xf32>
    %190 = arith.mulf %161, %189 : vector<16x32xf32>
    %cst_70 = arith.constant 1.000000e+00 : f32
    %191 = vector.broadcast %cst_70 : f32 to vector<16x32xf32>
    %192 = arith.addf %191, %190 : vector<16x32xf32>
    %193 = arith.mulf %154, %192 : vector<16x32xf32>
    %194 = vector.extract_strided_slice %11 {offsets = [32, 0], sizes = [32, 33], strides = [1, 1]} : vector<64x33xf32> to vector<32x33xf32>
    %cst_71 = arith.constant dense<0.000000e+00> : vector<16x33xf32>
    %195 = tpu.matmul %193, %194, %cst_71 {dimension_numbers = #tpu.dot_dimension_numbers<[1], [0], [0], [1], [0, 0, 1, 1], [], []>} : vector<16x32xf32>, vector<32x33xf32>, vector<16x33xf32> -> vector<16x33xf32>
    %196 = arith.addf %104, %195 : vector<16x33xf32>
    %197 = vector.extract_strided_slice %196 {offsets = [0, 0], sizes = [16, 32], strides = [1, 1]} : vector<16x33xf32> to vector<16x32xf32>
    %198 = vector.extract_strided_slice %196 {offsets = [0, 32], sizes = [16, 1], strides = [1, 1]} : vector<16x33xf32> to vector<16x1xf32>
    %199 = vector.extract_strided_slice %8 {offsets = [2, 0], sizes = [1, 32], strides = [1, 1]} : vector<17x32xf32> to vector<1x32xf32>
    %cst_72 = arith.constant dense<0.000000e+00> : vector<1x16xf32>
    %200 = tpu.matmul %199, %197, %cst_72 {dimension_numbers = #tpu.dot_dimension_numbers<[1], [1], [0], [0], [0, 0, 1, 0], [], []>} : vector<1x32xf32>, vector<16x32xf32>, vector<1x16xf32> -> vector<1x16xf32>
    %201 = vector.broadcast %198 : vector<16x1xf32> to vector<16x16xf32>
    %202 = vector.broadcast %200 : vector<1x16xf32> to vector<16x16xf32>
    %203 = arith.addf %201, %202 : vector<16x16xf32>
    %cst_73 = arith.constant 0.000000e+00 : f32
    %204 = vector.broadcast %cst_73 : f32 to vector<16x16xf32>
    %205 = arith.cmpf ogt, %203, %204 : vector<16x16xf32>
    %cst_74 = arith.constant 2.000000e-02 : f32
    %206 = vector.broadcast %cst_74 : f32 to vector<16x16xf32>
    %207 = arith.mulf %206, %203 : vector<16x16xf32>
    %208 = arith.select %205, %203, %207 : vector<16x16xi1>, vector<16x16xf32>
    %209 = arith.addf %208, %3 : vector<16x16xf32>
    %cst_75 = arith.constant dense<0xFF800000> : vector<16xf32>
    %210 = vector.multi_reduction <maximumf>, %209, %cst_75 [1] : vector<16x16xf32> to vector<16xf32>
    %211 = vector.shape_cast %210 : vector<16xf32> to vector<16x1xf32>
    %212 = vector.broadcast %211 : vector<16x1xf32> to vector<16x16xf32>
    %213 = arith.subf %209, %212 : vector<16x16xf32>
    %214 = math.exp %213 : vector<16x16xf32>
    %cst_76 = arith.constant dense<0.000000e+00> : vector<16xf32>
    %215 = vector.multi_reduction <add>, %214, %cst_76 [1] : vector<16x16xf32> to vector<16xf32>
    %216 = vector.shape_cast %215 : vector<16xf32> to vector<16x1xf32>
    %217 = tpu.reciprocal %216 {approx = true} : vector<16x1xf32> -> vector<16x1xf32>
    %218 = vector.broadcast %217 : vector<16x1xf32> to vector<16x16xf32>
    %219 = arith.mulf %214, %218 : vector<16x16xf32>
    %cst_77 = arith.constant dense<0.000000e+00> : vector<16x32xf32>
    %220 = tpu.matmul %219, %197, %cst_77 {dimension_numbers = #tpu.dot_dimension_numbers<[1], [0], [0], [1], [0, 0, 1, 1], [], []>} : vector<16x16xf32>, vector<16x32xf32>, vector<16x32xf32> -> vector<16x32xf32>
    %221 = vector.extract_strided_slice %8 {offsets = [7, 0], sizes = [1, 32], strides = [1, 1]} : vector<17x32xf32> to vector<1x32xf32>
    %222 = vector.extract_strided_slice %8 {offsets = [8, 0], sizes = [1, 32], strides = [1, 1]} : vector<17x32xf32> to vector<1x32xf32>
    %cst_78 = arith.constant dense<0.000000e+00> : vector<16xf32>
    %223 = vector.multi_reduction <add>, %220, %cst_78 [1] : vector<16x32xf32> to vector<16xf32>
    %224 = vector.shape_cast %223 : vector<16xf32> to vector<16x1xf32>
    %cst_79 = arith.constant 3.200000e+01 : f32
    %225 = vector.broadcast %cst_79 : f32 to vector<16x1xf32>
    %226 = arith.divf %224, %225 : vector<16x1xf32>
    %227 = vector.broadcast %226 : vector<16x1xf32> to vector<16x32xf32>
    %228 = arith.subf %220, %227 : vector<16x32xf32>
    %229 = arith.mulf %228, %228 : vector<16x32xf32>
    %cst_80 = arith.constant dense<0.000000e+00> : vector<16xf32>
    %230 = vector.multi_reduction <add>, %229, %cst_80 [1] : vector<16x32xf32> to vector<16xf32>
    %231 = vector.shape_cast %230 : vector<16xf32> to vector<16x1xf32>
    %cst_81 = arith.constant 3.200000e+01 : f32
    %232 = vector.broadcast %cst_81 : f32 to vector<16x1xf32>
    %233 = arith.divf %231, %232 : vector<16x1xf32>
    %234 = vector.broadcast %226 : vector<16x1xf32> to vector<16x32xf32>
    %235 = arith.subf %220, %234 : vector<16x32xf32>
    %cst_82 = arith.constant 9.99999974E-6 : f32
    %236 = vector.broadcast %cst_82 : f32 to vector<16x1xf32>
    %237 = arith.addf %233, %236 : vector<16x1xf32>
    %238 = math.rsqrt %237 : vector<16x1xf32>
    %239 = vector.broadcast %238 : vector<16x1xf32> to vector<16x32xf32>
    %240 = arith.mulf %235, %239 : vector<16x32xf32>
    %241 = vector.broadcast %221 : vector<1x32xf32> to vector<16x32xf32>
    %242 = arith.mulf %240, %241 : vector<16x32xf32>
    %243 = vector.broadcast %222 : vector<1x32xf32> to vector<16x32xf32>
    %244 = arith.addf %242, %243 : vector<16x32xf32>
    %cst_83 = arith.constant 5.000000e-01 : f32
    %245 = vector.broadcast %cst_83 : f32 to vector<16x32xf32>
    %246 = arith.mulf %245, %244 : vector<16x32xf32>
    %cst_84 = arith.constant 0.707106769 : f32
    %247 = vector.broadcast %cst_84 : f32 to vector<16x32xf32>
    %248 = arith.mulf %244, %247 : vector<16x32xf32>
    %cst_85 = arith.constant 0.000000e+00 : f32
    %249 = vector.broadcast %cst_85 : f32 to vector<16x32xf32>
    %250 = arith.cmpf oge, %248, %249 : vector<16x32xf32>
    %cst_86 = arith.constant 1.000000e+00 : f32
    %cst_87 = arith.constant -1.000000e+00 : f32
    %251 = vector.broadcast %cst_86 : f32 to vector<16x32xf32>
    %252 = vector.broadcast %cst_87 : f32 to vector<16x32xf32>
    %253 = arith.select %250, %251, %252 : vector<16x32xi1>, vector<16x32xf32>
    %254 = math.absf %248 : vector<16x32xf32>
    %cst_88 = arith.constant 0.327591091 : f32
    %255 = vector.broadcast %cst_88 : f32 to vector<16x32xf32>
    %256 = arith.mulf %255, %254 : vector<16x32xf32>
    %cst_89 = arith.constant 1.000000e+00 : f32
    %257 = vector.broadcast %cst_89 : f32 to vector<16x32xf32>
    %258 = arith.addf %257, %256 : vector<16x32xf32>
    %cst_90 = arith.constant 1.000000e+00 : f32
    %259 = vector.broadcast %cst_90 : f32 to vector<16x32xf32>
    %260 = arith.divf %259, %258 : vector<16x32xf32>
    %cst_91 = arith.constant 1.06140542 : f32
    %261 = vector.broadcast %cst_91 : f32 to vector<16x32xf32>
    %262 = arith.mulf %261, %260 : vector<16x32xf32>
    %cst_92 = arith.constant -1.45315206 : f32
    %263 = vector.broadcast %cst_92 : f32 to vector<16x32xf32>
    %264 = arith.addf %262, %263 : vector<16x32xf32>
    %265 = arith.mulf %264, %260 : vector<16x32xf32>
    %cst_93 = arith.constant 1.42141378 : f32
    %266 = vector.broadcast %cst_93 : f32 to vector<16x32xf32>
    %267 = arith.addf %265, %266 : vector<16x32xf32>
    %268 = arith.mulf %267, %260 : vector<16x32xf32>
    %cst_94 = arith.constant -0.284496725 : f32
    %269 = vector.broadcast %cst_94 : f32 to vector<16x32xf32>
    %270 = arith.addf %268, %269 : vector<16x32xf32>
    %271 = arith.mulf %270, %260 : vector<16x32xf32>
    %cst_95 = arith.constant 0.254829586 : f32
    %272 = vector.broadcast %cst_95 : f32 to vector<16x32xf32>
    %273 = arith.addf %271, %272 : vector<16x32xf32>
    %274 = arith.mulf %273, %260 : vector<16x32xf32>
    %cst_96 = arith.constant 0.000000e+00 : f32
    %275 = vector.broadcast %cst_96 : f32 to vector<16x32xf32>
    %276 = arith.subf %275, %254 : vector<16x32xf32>
    %277 = arith.mulf %276, %254 : vector<16x32xf32>
    %278 = math.exp %277 : vector<16x32xf32>
    %279 = arith.mulf %274, %278 : vector<16x32xf32>
    %cst_97 = arith.constant 1.000000e+00 : f32
    %280 = vector.broadcast %cst_97 : f32 to vector<16x32xf32>
    %281 = arith.subf %280, %279 : vector<16x32xf32>
    %282 = arith.mulf %253, %281 : vector<16x32xf32>
    %cst_98 = arith.constant 1.000000e+00 : f32
    %283 = vector.broadcast %cst_98 : f32 to vector<16x32xf32>
    %284 = arith.addf %283, %282 : vector<16x32xf32>
    %285 = arith.mulf %246, %284 : vector<16x32xf32>
    %c96 = arith.constant 96 : index
    %c0_99 = arith.constant 0 : index
    %286 = vector.load %arg5[%c96, %c0_99] : memref<280x66xf32, #tpu.memory_space<vmem>>, vector<32x32xf32>
    %cst_100 = arith.constant dense<0.000000e+00> : vector<16x32xf32>
    %287 = tpu.matmul %285, %286, %cst_100 {dimension_numbers = #tpu.dot_dimension_numbers<[1], [0], [0], [1], [0, 0, 1, 1], [], []>} : vector<16x32xf32>, vector<32x32xf32>, vector<16x32xf32> -> vector<16x32xf32>
    %288 = vector.extract_strided_slice %8 {offsets = [9, 0], sizes = [1, 32], strides = [1, 1]} : vector<17x32xf32> to vector<1x32xf32>
    %289 = vector.broadcast %288 : vector<1x32xf32> to vector<16x32xf32>
    %290 = arith.addf %287, %289 : vector<16x32xf32>
    %291 = arith.addf %290, %1 : vector<16x32xf32>
    %292 = vector.extract_strided_slice %8 {offsets = [10, 0], sizes = [1, 32], strides = [1, 1]} : vector<17x32xf32> to vector<1x32xf32>
    %293 = vector.extract_strided_slice %8 {offsets = [11, 0], sizes = [1, 32], strides = [1, 1]} : vector<17x32xf32> to vector<1x32xf32>
    %cst_101 = arith.constant dense<0.000000e+00> : vector<16xf32>
    %294 = vector.multi_reduction <add>, %291, %cst_101 [1] : vector<16x32xf32> to vector<16xf32>
    %295 = vector.shape_cast %294 : vector<16xf32> to vector<16x1xf32>
    %cst_102 = arith.constant 3.200000e+01 : f32
    %296 = vector.broadcast %cst_102 : f32 to vector<16x1xf32>
    %297 = arith.divf %295, %296 : vector<16x1xf32>
    %298 = vector.broadcast %297 : vector<16x1xf32> to vector<16x32xf32>
    %299 = arith.subf %291, %298 : vector<16x32xf32>
    %300 = arith.mulf %299, %299 : vector<16x32xf32>
    %cst_103 = arith.constant dense<0.000000e+00> : vector<16xf32>
    %301 = vector.multi_reduction <add>, %300, %cst_103 [1] : vector<16x32xf32> to vector<16xf32>
    %302 = vector.shape_cast %301 : vector<16xf32> to vector<16x1xf32>
    %cst_104 = arith.constant 3.200000e+01 : f32
    %303 = vector.broadcast %cst_104 : f32 to vector<16x1xf32>
    %304 = arith.divf %302, %303 : vector<16x1xf32>
    %305 = vector.broadcast %297 : vector<16x1xf32> to vector<16x32xf32>
    %306 = arith.subf %291, %305 : vector<16x32xf32>
    %cst_105 = arith.constant 9.99999974E-6 : f32
    %307 = vector.broadcast %cst_105 : f32 to vector<16x1xf32>
    %308 = arith.addf %304, %307 : vector<16x1xf32>
    %309 = math.rsqrt %308 : vector<16x1xf32>
    %310 = vector.broadcast %309 : vector<16x1xf32> to vector<16x32xf32>
    %311 = arith.mulf %306, %310 : vector<16x32xf32>
    %312 = vector.broadcast %292 : vector<1x32xf32> to vector<16x32xf32>
    %313 = arith.mulf %311, %312 : vector<16x32xf32>
    %314 = vector.broadcast %293 : vector<1x32xf32> to vector<16x32xf32>
    %315 = arith.addf %313, %314 : vector<16x32xf32>
    %c64 = arith.constant 64 : index
    %c0_106 = arith.constant 0 : index
    %316 = vector.load %arg5[%c64, %c0_106] : memref<280x66xf32, #tpu.memory_space<vmem>>, vector<32x64xf32>
    %cst_107 = arith.constant dense<0.000000e+00> : vector<16x64xf32>
    %317 = tpu.matmul %5, %316, %cst_107 {dimension_numbers = #tpu.dot_dimension_numbers<[1], [0], [0], [1], [0, 0, 1, 1], [], []>} : vector<16x32xf32>, vector<32x64xf32>, vector<16x64xf32> -> vector<16x64xf32>
    %318 = vector.extract_strided_slice %317 {offsets = [0, 0], sizes = [16, 32], strides = [1, 1]} : vector<16x64xf32> to vector<16x32xf32>
    %319 = vector.extract_strided_slice %8 {offsets = [12, 0], sizes = [1, 32], strides = [1, 1]} : vector<17x32xf32> to vector<1x32xf32>
    %320 = vector.broadcast %319 : vector<1x32xf32> to vector<16x32xf32>
    %321 = arith.addf %318, %320 : vector<16x32xf32>
    %c32 = arith.constant 32 : index
    %c0_108 = arith.constant 0 : index
    %322 = vector.load %arg5[%c32, %c0_108] : memref<280x66xf32, #tpu.memory_space<vmem>>, vector<32x64xf32>
    %cst_109 = arith.constant dense<0.000000e+00> : vector<16x64xf32>
    %323 = tpu.matmul %315, %322, %cst_109 {dimension_numbers = #tpu.dot_dimension_numbers<[1], [0], [0], [1], [0, 0, 1, 1], [], []>} : vector<16x32xf32>, vector<32x64xf32>, vector<16x64xf32> -> vector<16x64xf32>
    %324 = vector.extract_strided_slice %323 {offsets = [0, 0], sizes = [16, 32], strides = [1, 1]} : vector<16x64xf32> to vector<16x32xf32>
    %325 = vector.extract_strided_slice %8 {offsets = [13, 0], sizes = [1, 32], strides = [1, 1]} : vector<17x32xf32> to vector<1x32xf32>
    %326 = vector.broadcast %325 : vector<1x32xf32> to vector<16x32xf32>
    %327 = arith.addf %324, %326 : vector<16x32xf32>
    %328 = vector.extract_strided_slice %323 {offsets = [0, 32], sizes = [16, 32], strides = [1, 1]} : vector<16x64xf32> to vector<16x32xf32>
    %329 = vector.extract_strided_slice %8 {offsets = [14, 0], sizes = [1, 32], strides = [1, 1]} : vector<17x32xf32> to vector<1x32xf32>
    %330 = vector.broadcast %329 : vector<1x32xf32> to vector<16x32xf32>
    %331 = arith.addf %328, %330 : vector<16x32xf32>
    %cst_110 = arith.constant dense<0.000000e+00> : vector<16x16xf32>
    %332 = tpu.matmul %321, %327, %cst_110 {dimension_numbers = #tpu.dot_dimension_numbers<[1], [1], [0], [0], [0, 0, 1, 0], [], []>} : vector<16x32xf32>, vector<16x32xf32>, vector<16x16xf32> -> vector<16x16xf32>
    %333 = arith.addf %332, %7 : vector<16x16xf32>
    %cst_111 = arith.constant dense<0xFF800000> : vector<16xf32>
    %334 = vector.multi_reduction <maximumf>, %333, %cst_111 [1] : vector<16x16xf32> to vector<16xf32>
    %335 = vector.shape_cast %334 : vector<16xf32> to vector<16x1xf32>
    %336 = vector.broadcast %335 : vector<16x1xf32> to vector<16x16xf32>
    %337 = arith.subf %333, %336 : vector<16x16xf32>
    %338 = math.exp %337 : vector<16x16xf32>
    %cst_112 = arith.constant dense<0.000000e+00> : vector<16xf32>
    %339 = vector.multi_reduction <add>, %338, %cst_112 [1] : vector<16x16xf32> to vector<16xf32>
    %340 = vector.shape_cast %339 : vector<16xf32> to vector<16x1xf32>
    %341 = tpu.reciprocal %340 {approx = true} : vector<16x1xf32> -> vector<16x1xf32>
    %342 = vector.broadcast %341 : vector<16x1xf32> to vector<16x16xf32>
    %343 = arith.mulf %338, %342 : vector<16x16xf32>
    %cst_113 = arith.constant dense<0.000000e+00> : vector<16x32xf32>
    %344 = tpu.matmul %343, %331, %cst_113 {dimension_numbers = #tpu.dot_dimension_numbers<[1], [0], [0], [1], [0, 0, 1, 1], [], []>} : vector<16x16xf32>, vector<16x32xf32>, vector<16x32xf32> -> vector<16x32xf32>
    %c128 = arith.constant 128 : index
    %c0_114 = arith.constant 0 : index
    %345 = vector.load %arg5[%c128, %c0_114] : memref<280x66xf32, #tpu.memory_space<vmem>>, vector<32x32xf32>
    %cst_115 = arith.constant dense<0.000000e+00> : vector<16x32xf32>
    %346 = tpu.matmul %344, %345, %cst_115 {dimension_numbers = #tpu.dot_dimension_numbers<[1], [0], [0], [1], [0, 0, 1, 1], [], []>} : vector<16x32xf32>, vector<32x32xf32>, vector<16x32xf32> -> vector<16x32xf32>
    %347 = vector.extract_strided_slice %8 {offsets = [15, 0], sizes = [1, 32], strides = [1, 1]} : vector<17x32xf32> to vector<1x32xf32>
    %348 = vector.broadcast %347 : vector<1x32xf32> to vector<16x32xf32>
    %349 = arith.addf %346, %348 : vector<16x32xf32>
    %350 = vector.extract_strided_slice %317 {offsets = [0, 32], sizes = [16, 32], strides = [1, 1]} : vector<16x64xf32> to vector<16x32xf32>
    %c160 = arith.constant 160 : index
    %c0_116 = arith.constant 0 : index
    %351 = vector.load %arg5[%c160, %c0_116] : memref<280x66xf32, #tpu.memory_space<vmem>>, vector<32x32xf32>
    %cst_117 = arith.constant dense<0.000000e+00> : vector<16x32xf32>
    %352 = tpu.matmul %349, %351, %cst_117 {dimension_numbers = #tpu.dot_dimension_numbers<[1], [0], [0], [1], [0, 0, 1, 1], [], []>} : vector<16x32xf32>, vector<32x32xf32>, vector<16x32xf32> -> vector<16x32xf32>
    %353 = arith.addf %350, %352 : vector<16x32xf32>
    %354 = vector.extract_strided_slice %8 {offsets = [16, 0], sizes = [1, 32], strides = [1, 1]} : vector<17x32xf32> to vector<1x32xf32>
    %355 = vector.broadcast %354 : vector<1x32xf32> to vector<16x32xf32>
    %356 = arith.addf %353, %355 : vector<16x32xf32>
    %cst_118 = arith.constant 0.000000e+00 : f32
    %357 = vector.broadcast %cst_118 : f32 to vector<16x32xf32>
    %358 = arith.subf %357, %356 : vector<16x32xf32>
    %359 = math.exp %358 : vector<16x32xf32>
    %cst_119 = arith.constant 1.000000e+00 : f32
    %360 = vector.broadcast %cst_119 : f32 to vector<16x32xf32>
    %361 = arith.addf %360, %359 : vector<16x32xf32>
    %cst_120 = arith.constant 1.000000e+00 : f32
    %362 = vector.broadcast %cst_120 : f32 to vector<16x32xf32>
    %363 = arith.divf %362, %361 : vector<16x32xf32>
    %cst_121 = arith.constant 1.000000e+00 : f32
    %364 = vector.broadcast %cst_121 : f32 to vector<16x32xf32>
    %365 = arith.subf %364, %363 : vector<16x32xf32>
    %366 = arith.mulf %365, %5 : vector<16x32xf32>
    %367 = arith.mulf %363, %349 : vector<16x32xf32>
    %368 = arith.addf %366, %367 : vector<16x32xf32>
    %c0_122 = arith.constant 0 : index
    %c0_123 = arith.constant 0 : index
    %c0_124 = arith.constant 0 : index
    %369 = vector.load %arg6[%c0_122, %c0_123, %c0_124] : memref<1x16x32xf32, #tpu.memory_space<vmem>>, vector<1x16x32xf32>
    %370 = vector.shape_cast %369 : vector<1x16x32xf32> to vector<16x32xf32>
    %371 = vector.shape_cast %368 : vector<16x32xf32> to vector<1x16x32xf32>
    tpu.vector_store %arg6[%c0_122, %c0_123, %c0_124], %371 {strides = array<i32>} : memref<1x16x32xf32, #tpu.memory_space<vmem>>, vector<1x16x32xf32>,
    return
  }
  func.func @transform_0(%arg0: i32) -> (i32, i32, i32) {
    %c0_i32 = arith.constant 0 : i32
    %c0_i32_0 = arith.constant 0 : i32
    %c0_i32_1 = arith.constant 0 : i32
    return %arg0, %c0_i32, %c0_i32_0 : i32, i32, i32
  }
  func.func @transform_1(%arg0: i32) -> (i32, i32, i32) {
    %c0_i32 = arith.constant 0 : i32
    %c0_i32_0 = arith.constant 0 : i32
    %c0_i32_1 = arith.constant 0 : i32
    return %arg0, %c0_i32, %c0_i32_0 : i32, i32, i32
  }
  func.func @transform_2(%arg0: i32) -> (i32, i32, i32) {
    %c0_i32 = arith.constant 0 : i32
    %c0_i32_0 = arith.constant 0 : i32
    %c0_i32_1 = arith.constant 0 : i32
    return %arg0, %c0_i32, %c0_i32_0 : i32, i32, i32
  }
  func.func @transform_3(%arg0: i32) -> (i32, i32, i32) {
    %c0_i32 = arith.constant 0 : i32
    %c0_i32_0 = arith.constant 0 : i32
    %c0_i32_1 = arith.constant 0 : i32
    return %arg0, %c0_i32, %c0_i32_0 : i32, i32, i32
  }
  func.func @transform_4(%arg0: i32) -> (i32, i32) {
    %c0_i32 = arith.constant 0 : i32
    %c0_i32_0 = arith.constant 0 : i32
    %c0_i32_1 = arith.constant 0 : i32
    return %c0_i32, %c0_i32_0 : i32, i32
  }
  func.func @transform_5(%arg0: i32) -> (i32, i32, i32) {
    %c0_i32 = arith.constant 0 : i32
    %c0_i32_0 = arith.constant 0 : i32
    %c0_i32_1 = arith.constant 0 : i32
    return %arg0, %c0_i32, %c0_i32_0 : i32, i32, i32
  }
}

</mosaic_0001>

<bundles_post_ra>
// kernel: graph_fused_forward.1
= control target key start
LH: loop header
LB: loop body
LE: loop exit
PB: predicated region body
PF: predicated region fallthrough
CT: control target
= control target key end

     0   :  { %vm36_vm0 = vcmask 261120   ;;  %v2436_v7 = vmov 0.0|0.0   ;;  %vm2437_vm2 = vmmov 0   ;;  %v2438_v11 = vmov 0.0   ;;  %s2863_s0 = inlined_call_operand.vmem [shape: f32[1,16,32], index: 0, kind: input, shape index: {}]   ;;  %s2864_s1 = inlined_call_operand.vmem [shape: f32[1,16,16], index: 1, kind: input, shape index: {}]   ;;  %s2865_s2 = inlined_call_operand.vmem [shape: f32[1,16,32], index: 2, kind: input, shape index: {}]   ;;  %s2866_s3 = inlined_call_operand.vmem [shape: f32[1,16,16], index: 3, kind: input, shape index: {}]   ;;  %s2867_s4 = inlined_call_operand.vmem [shape: f32[280,66], index: 4, kind: input, shape index: {}]   ;;  %s2868_s5 = inlined_call_operand.hbm [shape: f32[1,16,32], index: 5, kind: output, shape index: {}]  }
   0x1   :  { %v32_v0 = vld [vmem:[%s2867_s4] sm:$0xff]  ;;  %v33_v1 = vld [vmem:[%s2867_s4 + $0x8] sm:$0xff]  ;;  %v34_v2 = vld [vmem:[%s2867_s4 + $0x10] sm:$0xff]  ;;  %2212 = vmatprep.subr.bf16.mxu1 %v2436_v7  ;;  %2075 = vmatprep.mubr.msk.f32.mxu1 %vm2437_vm2, %v2438_v11 }
   0x2   :  { %v2204_v3 = vpack.c.bf16 %v33_v1, %v32_v0  ;;  %v35_v4 = vld [vmem:[%s2867_s4 + $0x18] sm:$0xff]  ;;  %v21_v5 = vld [vmem:[%s2863_s0] sm:$0xff]  ;;  %v22_v6 = vld [vmem:[%s2863_s0 + $0x8] sm:$0xff] }
   0x3   :  { %v2208_v8 = vpack.c.bf16 %v35_v4, %v34_v2  ;;  %2068 = vmatprep.mubr.msk.f32.mxu0 %vm36_vm0, %v21_v5  ;;  %v2213_v9 = vpack.c.bf16 %v22_v6, %v21_v5  ;;  %vm2499_vm1 = vmpackc.low %vm36_vm0, %vm36_vm0 }
   0x4   :  { %2205 = vmatprep.subr.bf16.mxu0 %v2204_v3 }
   0x5   :  { %10 = vsyncpa [#allocation3], 0  ;;  %2207 = vmatpush3.bf16.msra.mxu0 %v2204_v3  ;;  %2215 = vmatpush3.bf16.xpose.msk.msra.mxu1 %vm2499_vm1, %v2213_v9  ;;  %v2509_v12 = vld [vmem:[%s2867_s4 + $0x100] sm:$0xff]  ;;  %v2439_v14 = vmov 65   ;;  %v2440_v15 = vmov 64   ;;  %v209_v24 = vlaneseq  ;;  %vm223_vm5 = vcmask 130048  }
   0x6   :  { %2209 = vmatprep.subr.bf16.mxu0 %v2208_v8  ;;  %2220 = vmatprep.subr.bf16.mxu1 %v2436_v7  ;;  %v420_v13 = vrot.slane %v2509_v12, 1  ;;  %v2542_v33 = vld [vmem:[%s2864_s1] sm:$0xff]  ;;  %v2548_v43 = vld [vmem:[%s2864_s1 + $0x8] sm:$0xff]  ;;  %s2441_s1 = smov 96   ;;  %s2444_s13 = smov 32  }
   0x7   :  { %2317 = vset.pattern.permute.xlu1 %v2439_v14  ;;  %2316 = vset.pattern.permute.xlu0 %v2440_v15  ;;  %v2532_v25 = vshrl.u32 %v209_v24, 7 }
   0x9   :  { %2211 = vmatpush3.bf16.msra.mxu0 %v2208_v8  ;;  %v2535_v26 = vsub.s32 0, %v2532_v25 }
   0xc   :  { %2069 = vmatmul.mubr.msk.f32.vlgmr.msra.gmra.mrb[0].mxu0 %vm36_vm0, %v22_v6  ;;  %2076 = vmatmul.mubr.msk.f32.vlgmr.msra.gmra.mrb[0].mxu1 %vm36_vm0, %v2509_v12 }
   0xd   :  { %2223 = vmatpush3.bf16.xpose.msk.msra.mxu1 %vm2499_vm1, %v2213_v9  ;;  %2089 = vmatprep.mubr.msk.f32.mxu1 %vm2437_vm2, %v2438_v11 }
   0xe   :  { %2244 = vmatprep.subr.bf16.mxu1 %v2436_v7 }
  0x14   :  { %2090 = vmatmul.mubr.msk.f32.vlgmr.msra.gmra.mrb[2].mxu1 %vm36_vm0, %v420_v13 }
  0x15   :  { %2125 = vmatprep.mubr.msk.f32.mxu1 %vm2437_vm2, %v2438_v11 }
  0xdf   :  { %v2520_v16 = vpop.f32.mrb[0].mxu0  ;;  %v195_v17 = vpop.f32.mrb[0].mxu1 }
  0xe0   :  { %v2522_v18 = vpop.f32.mrb[1].mxu0  ;;  %v2077_v19 = vpop.f32.mrb[1].mxu1  ;;  %v212_v28 = vrot.slane %v195_v17, %v2535_v26 }
  0xe1   :  { %494 = vperm.xlu1 %2317, %v2522_v18   ;;  %201 = vperm.xlu0 %2316, %v2522_v18   ;;  %v2216_v20 = vpack.c.bf16 %v2520_v16, %v2522_v18  ;;  %v2318_v21 = vpack.i.bf16 %v2520_v16, %v2522_v18 }
  0xe3   :  { %2217 = vmatprep.subr.bf16.mxu0 %v2216_v20 }
  0xe4   :  { %2219 = vmatpush3.bf16.msra.mxu0 %v2216_v20 }
  0xe5   :  { %498 = vperm.xlu1 %2317, %v2520_v16   ;;  %206 = vperm.xlu0 %2316, %v2520_v16  }
  0xe7   :  { %v489_v22 = vpop.f32.mrb[2].mxu1 }
  0xe8   :  { %v2091_v23 = vpop.f32.mrb[3].mxu1  ;;  %v504_v27 = vrot.slane %v489_v22, %v2535_v26 }
 0x160   :  { %v495_v29 = vpop.permute.xlu1 %494  ;;  %v202_v30 = vpop.permute.xlu0 %201 }
 0x161   :  { %v505_v31 = vadd.f32 %v504_v27, %v495_v29  ;;  %v213_v32 = vadd.f32 %v212_v28, %v202_v30 }
 0x163   :  { %vm507_vm3 = vcmp.gt.f32.partialorder %v505_v31, 0.0  ;;  %v509_v34 = vmul.f32 0.02, %v505_v31  ;;  %vm215_vm4 = vcmp.gt.f32.partialorder %v213_v32, 0.0  ;;  %v217_v35 = vmul.f32 0.02, %v213_v32 }
 0x164   :  { %v499_v36 = vpop.permute.xlu1 %498  ;;  %v207_v37 = vpop.permute.xlu0 %206 }
 0x165   :  { %v506_v38 = vadd.f32 %v504_v27, %v499_v36  ;;  %v214_v39 = vadd.f32 %v212_v28, %v207_v37  ;;  %v219_v40 = vsel %vm215_vm4, %v213_v32, %v217_v35  ;;  %v511_v41 = vsel %vm507_vm3, %v505_v31, %v509_v34 }
 0x166   :  { %v221_v42 = vadd.f32 %v219_v40, %v2542_v33  ;;  %v513_v47 = vadd.f32 %v511_v41, %v2542_v33 }
 0x167   :  { %vm508_vm6 = vcmp.gt.f32.partialorder %v506_v38, 0.0  ;;  %v510_v44 = vmul.f32 0.02, %v506_v38  ;;  %vm216_vm7 = vcmp.gt.f32.partialorder %v214_v39, 0.0  ;;  %v218_v45 = vmul.f32 0.02, %v214_v39 }
 0x168   :  { %v224_v46 = vsel %vm223_vm5, %v221_v42, -inf  ;;  %v515_v51 = vsel %vm223_vm5, %v513_v47, -inf }
 0x169   :  { %225 = vmax.xlane.f32.xlu0 %v224_v46  ;;  %v220_v48 = vsel %vm216_vm7, %v214_v39, %v218_v45  ;;  %v512_v49 = vsel %vm508_vm6, %v506_v38, %v510_v44 }
 0x16a   :  { %v222_v50 = vadd.f32 %v220_v48, %v2548_v43  ;;  %v514_v53 = vadd.f32 %v512_v49, %v2548_v43 }
 0x16c   :  { %v227_v52 = vsel %vm223_vm5, %v222_v50, -inf  ;;  %v518_v54 = vsel %vm223_vm5, %v514_v53, -inf }
 0x16d   :  { %516 = vmax.xlane.f32.xlu0 %v515_v51  ;;  %228 = vmax.xlane.f32.xlu1 %v227_v52 }
 0x171   :  { %519 = vmax.xlane.f32.xlu0 %v518_v54 }
 0x1f6   :  { %v226_v55 = vpop.xlane.xlu0 %225 }
 0x1f7   :  { %v230_v56 = vsub.f32 %v221_v42, %v226_v55 }
 0x1f9   :  { %v232_v57 = vmul.f32 1.442695, %v230_v56 }
 0x1fa   :  { %v229_v58 = vpop.xlane.xlu1 %228  ;;  %v517_v59 = vpop.xlane.xlu0 %516 }
 0x1fb   :  { %2330 = vpow2.f32 %v232_v57  ;;  %v231_v60 = vsub.f32 %v222_v50, %v229_v58  ;;  %v521_v61 = vsub.f32 %v513_v47, %v517_v59 }
 0x1fd   :  { %v234_v62 = vmul.f32 1.442695, %v231_v60  ;;  %v523_v63 = vmul.f32 1.442695, %v521_v61  ;;  %v122_v61 = vld [vmem:[%s2867_s4 + $0xe0] sm:$0xff] }
 0x1fe   :  { %v520_v0 = vpop.xlane.xlu0 %519 }
 0x1ff   :  { %2332 = vpow2.f32 %v234_v62  ;;  %v522_v1 = vsub.f32 %v514_v53, %v520_v0  ;;  %v123_v62 = vld [vmem:[%s2867_s4 + $0xe8] sm:$0xff] }
 0x200   :  { %2334 = vpow2.f32 %v523_v63  ;;  %v124_v63 = vld [vmem:[%s2867_s4 + $0xf0] sm:$0xff]  ;;  %v2228_v0 = vpack.c.bf16 %v123_v62, %v122_v61 }
 0x201   :  { %v525_v2 = vmul.f32 1.442695, %v522_v1  ;;  %v125_v1 = vld [vmem:[%s2867_s4 + $0xf8] sm:$0xff] }
 0x203   :  { %2336 = vpow2.f32 %v525_v2  ;;  %v2232_v2 = vpack.c.bf16 %v125_v1, %v124_v63 }
 0x205   :  { %v2331_v3 = vpop.eup %2330 }
 0x206   :  { %v236_v4 = vsel %vm223_vm5, %v2331_v3, 0.0 }
 0x207   :  { %237 = vadd.xlane.f32.xlu1 %v236_v4  ;;  %v119_v4 = vld [vmem:[%s2867_s4 + $0xc8] sm:$0xff] }
 0x209   :  { %v2333_v5 = vpop.eup %2332 }
 0x20a   :  { %v2335_v6 = vpop.eup %2334  ;;  %v239_v7 = vsel %vm223_vm5, %v2333_v5, 0.0 }
 0x20b   :  { %240 = vadd.xlane.f32.xlu0 %v239_v7  ;;  %v527_v8 = vsel %vm223_vm5, %v2335_v6, 0.0 }
 0x20c   :  { %528 = vadd.xlane.f32.xlu1 %v527_v8 }
 0x20d   :  { %v2337_v9 = vpop.eup %2336 }
 0x20e   :  { %v530_v11 = vsel %vm223_vm5, %v2337_v9, 0.0 }
 0x20f   :  { %531 = vadd.xlane.f32.xlu0 %v530_v11 }
 0x21d   :  { %2319 = vrot.lane.b32.xlu1 %v2318_v21, %s2441_s1 }
 0x294   :  { %v238_v13 = vpop.xlane.xlu1 %237 }
 0x295   :  { %2338 = vrcp.f32 %v238_v13 }
 0x298   :  { %v241_v14 = vpop.xlane.xlu0 %240 }
 0x299   :  { %v529_v15 = vpop.xlane.xlu1 %528  ;;  %2340 = vrcp.f32 %v241_v14 }
 0x29a   :  { %2342 = vrcp.f32 %v529_v15 }
 0x29c   :  { %v532_v17 = vpop.xlane.xlu0 %531 }
 0x29d   :  { %v2320_v19 = vpop.permute.xlu1 %2319  ;;  %2344 = vrcp.f32 %v532_v17 }
 0x29e   :  { %v2322_v20 = vunpack.i.h.bf16 %v2320_v19  ;;  %v2321_v22 = vunpack.i.l.bf16 %v2320_v19  ;;  %v652_v19 = vsub.s32 5, %v2532_v25 }
 0x29f   :  { %v2339_v23 = vpop.eup %2338 }
 0x2a0   :  { %v2224_v24 = vpack.c.bf16 %v2322_v20, %v2321_v22  ;;  %v244_v27 = vmul.f32 %v2339_v23, %v2331_v3  ;;  %v118_v3 = vld [vmem:[%s2867_s4 + $0xc0] sm:$0xff]  ;;  %v658_v23 = vsub.s32 6, %v2532_v25 }
 0x2a2   :  { %2225 = vmatprep.subr.bf16.mxu0 %v2224_v24  ;;  %2082 = vmatprep.mubr.msk.f32.mxu0 %vm223_vm5, %v244_v27  ;;  %v653_v27 = vrot.slane %v2509_v12, %v652_v19 }
 0x2a3   :  { %v2341_v28 = vpop.eup %2340 }
 0x2a4   :  { %v2343_v16 = vpop.eup %2342  ;;  %v245_v18 = vmul.f32 %v2341_v28, %v2333_v5  ;;  %v2599_v5 = vpack.c.bf16 %v119_v4, %v118_v3 }
 0x2a5   :  { %v535_v21 = vmul.f32 %v2343_v16, %v2335_v6  ;;  %v2442_v6 = vmov 32  }
 0x2a6   :  { %2083 = vmatmul.mubr.msk.f32.vlgmr.msra.gmra.mrb[2].mxu0 %vm223_vm5, %v245_v18  ;;  %2324 = vset.pattern.permute.xlu1 %v2442_v6 }
 0x2a7   :  { %v2345_v29 = vpop.eup %2344  ;;  %2227 = vmatpush3.bf16.msra.mxu0 %v2224_v24  ;;  %2096 = vmatprep.mubr.msk.f32.mxu0 %vm223_vm5, %v535_v21  ;;  %v659_v21 = vrot.slane %v2509_v12, %v658_v23 }
 0x2a8   :  { %v536_v30 = vmul.f32 %v2345_v29, %v2337_v9  ;;  %2229 = vmatprep.subr.bf16.mxu0 %v2228_v0  ;;  %2323 = vset.pattern.permute.xlu0 %v2442_v6 }
 0x2aa   :  { %2097 = vmatmul.mubr.msk.f32.vlgmr.msra.gmra.mrb[4].mxu0 %vm223_vm5, %v536_v30 }
 0x2ab   :  { %2231 = vmatpush3.bf16.msra.mxu0 %v2228_v0 }
 0x2ac   :  { %2233 = vmatprep.subr.bf16.mxu0 %v2232_v2 }
 0x2af   :  { %2235 = vmatpush3.bf16.msra.mxu0 %v2232_v2 }
 0x2b0   :  { %2237 = vmatprep.subr.bf16.mxu0 %v2599_v5 }
 0x379   :  { %v2084_v31 = vpop.f32.mrb[2].mxu0 }
 0x37a   :  { %v318_v32 = vpop.f32.mrb[3].mxu0  ;;  %v330_v39 = vsel %vm36_vm0, %v2084_v31, 0.0 }
 0x37b   :  { %v327_v38 = vsel %vm36_vm0, %v318_v32, 0.0 }
 0x37d   :  { %v2098_v34 = vpop.f32.mrb[4].mxu0 }
 0x37e   :  { %v615_v35 = vpop.f32.mrb[5].mxu0  ;;  %v627_v37 = vsel %vm36_vm0, %v2098_v34, 0.0 }
 0x37f   :  { %v624_v36 = vsel %vm36_vm0, %v615_v35, 0.0 }
 0x380   :  { %625 = vadd.xlane.f32.xlu0 %v624_v36 }
 0x384   :  { %628 = vadd.xlane.f32.xlu0 %v627_v37 }
 0x388   :  { %328 = vadd.xlane.f32.xlu0 %v327_v38 }
 0x38c   :  { %331 = vadd.xlane.f32.xlu0 %v330_v39 }
 0x40d   :  { %v626_v40 = vpop.xlane.xlu0 %625 }
 0x40e   :  { %v630_v41 = vmul.f32 0.03125, %v626_v40 }
 0x410   :  { %v632_v42 = vsub.f32 %v615_v35, %v630_v41  ;;  %v362_v35 = vsub.s32 4, %v2532_v25 }
 0x411   :  { %v629_v44 = vpop.xlane.xlu0 %628 }
 0x412   :  { %v631_v45 = vmul.f32 0.03125, %v629_v44  ;;  %v634_v46 = vmul.f32 %v632_v42, %v632_v42  ;;  %v363_v44 = vrot.slane %v2509_v12, %v362_v35 }
 0x414   :  { %v633_v47 = vsub.f32 %v2098_v34, %v631_v45  ;;  %v636_v48 = vsel %vm36_vm0, %v634_v46, 0.0 }
 0x415   :  { %637 = vadd.xlane.f32.xlu1 %v636_v48  ;;  %v329_v49 = vpop.xlane.xlu0 %328 }
 0x416   :  { %v334_v50 = vmul.f32 0.03125, %v329_v49  ;;  %v635_v51 = vmul.f32 %v633_v47, %v633_v47 }
 0x418   :  { %v336_v52 = vsub.f32 %v318_v32, %v334_v50  ;;  %v639_v53 = vsel %vm36_vm0, %v635_v51, 0.0 }
 0x419   :  { %640 = vadd.xlane.f32.xlu0 %v639_v53  ;;  %v332_v54 = vpop.xlane.xlu0 %331 }
 0x41a   :  { %v335_v55 = vmul.f32 0.03125, %v332_v54  ;;  %v338_v56 = vmul.f32 %v336_v52, %v336_v52 }
 0x41c   :  { %v2575_v57 = vsub.f32 %v2084_v31, %v335_v55  ;;  %v340_v58 = vsel %vm36_vm0, %v338_v56, 0.0  ;;  %v356_v31 = vsub.s32 3, %v2532_v25 }
 0x41d   :  { %341 = vadd.xlane.f32.xlu0 %v340_v58 }
 0x41e   :  { %v339_v59 = vmul.f32 %v2575_v57, %v2575_v57  ;;  %v357_v39 = vrot.slane %v2509_v12, %v356_v31 }
 0x420   :  { %v343_v60 = vsel %vm36_vm0, %v339_v59, 0.0 }
 0x421   :  { %344 = vadd.xlane.f32.xlu0 %v343_v60 }
 0x4a2   :  { %v638_v7 = vpop.xlane.xlu1 %637 }
 0x4a3   :  { %v642_v8 = vmul.f32 0.03125, %v638_v7 }
 0x4a5   :  { %v644_v9 = vadd.f32 1e-05, %v642_v8 }
 0x4a6   :  { %v641_v11 = vpop.xlane.xlu0 %640 }
 0x4a7   :  { %2346 = vrsqrt.f32 %v644_v9  ;;  %v643_v13 = vmul.f32 0.03125, %v641_v11 }
 0x4a9   :  { %v645_v14 = vadd.f32 1e-05, %v643_v13 }
 0x4aa   :  { %v342_v15 = vpop.xlane.xlu0 %341 }
 0x4ab   :  { %2348 = vrsqrt.f32 %v645_v14  ;;  %v346_v17 = vmul.f32 0.03125, %v342_v15 }
 0x4ad   :  { %v348_v20 = vadd.f32 1e-05, %v346_v17 }
 0x4ae   :  { %v345_v22 = vpop.xlane.xlu0 %344 }
 0x4af   :  { %2350 = vrsqrt.f32 %v348_v20  ;;  %v347_v24 = vmul.f32 0.03125, %v345_v22 }
 0x4b1   :  { %v2347_v28 = vpop.eup %2346  ;;  %v349_v16 = vadd.f32 1e-05, %v347_v24 }
 0x4b2   :  { %v648_v18 = vmul.f32 %v2347_v28, %v632_v42 }
 0x4b3   :  { %2352 = vrsqrt.f32 %v349_v16 }
 0x4b4   :  { %v654_v29 = vmul.f32 %v653_v27, %v648_v18 }
 0x4b5   :  { %v2349_v30 = vpop.eup %2348 }
 0x4b6   :  { %v649_v32 = vmul.f32 %v2349_v30, %v633_v47  ;;  %v2611_v34 = vadd.f32 %v659_v21, %v654_v29 }
 0x4b8   :  { %v655_v36 = vmul.f32 %v653_v27, %v649_v32  ;;  %v2615_v37 = vmul.f32 0.70710677, %v2611_v34 }
 0x4b9   :  { %v2351_v38 = vpop.eup %2350 }
 0x4ba   :  { %v352_v40 = vmul.f32 %v2351_v38, %v336_v52  ;;  %v2620_v41 = vadd.f32 %v659_v21, %v655_v36  ;;  %v670_v42 = vand.u32 2147483647, %v2615_v37  ;;  %vm666_vm8 = vcmp.ge.f32.partialorder %v2615_v37, 0.0 }
 0x4bb   :  { %v662_v37 = vmul.f32 0.5, %v2611_v34 }
 0x4bc   :  { %v2627_v45 = vmul.f32 0.70710677, %v2620_v41  ;;  %v672_v46 = vmul.f32 0.3275911, %v670_v42  ;;  %v358_v48 = vmul.f32 %v357_v39, %v352_v40  ;;  %v698_v61 = vsub.f32 0.0, %v670_v42 }
 0x4bd   :  { %v2353_v47 = vpop.eup %2352 }
 0x4be   :  { %v353_v49 = vmul.f32 %v2353_v47, %v2575_v57  ;;  %v671_v50 = vand.u32 2147483647, %v2627_v45  ;;  %v674_v51 = vadd.f32 1.0, %v672_v46  ;;  %v2631_v52 = vadd.f32 %v363_v44, %v358_v48 }
 0x4bf   :  { %v700_v3 = vmul.f32 %v698_v61, %v670_v42  ;;  %vm667_vm9 = vcmp.ge.f32.partialorder %v2627_v45, 0.0  ;;  %v121_v45 = vld [vmem:[%s2867_s4 + $0xd8] sm:$0xff] }
 0x4c0   :  { %v359_v53 = vmul.f32 %v357_v39, %v353_v49  ;;  %v673_v54 = vmul.f32 0.3275911, %v671_v50  ;;  %2354 = vrcp.f32 %v674_v51  ;;  %v2634_v55 = vmul.f32 0.70710677, %v2631_v52 }
 0x4c1   :  { %v699_v2 = vsub.f32 0.0, %v671_v50  ;;  %v702_v11 = vmul.f32 1.442695, %v700_v3 }
 0x4c2   :  { %v675_v56 = vadd.f32 1.0, %v673_v54  ;;  %v2636_v58 = vadd.f32 %v363_v44, %v359_v53  ;;  %v374_v59 = vand.u32 2147483647, %v2634_v55  ;;  %vm370_vm10 = vcmp.ge.f32.partialorder %v2634_v55, 0.0 }
 0x4c3   :  { %v701_v9 = vmul.f32 %v699_v2, %v671_v50 }
 0x4c4   :  { %2356 = vrcp.f32 %v675_v56  ;;  %v2640_v60 = vmul.f32 0.70710677, %v2636_v58  ;;  %v376_v57 = vmul.f32 0.3275911, %v374_v59  ;;  %v402_v15 = vsub.f32 0.0, %v374_v59 }
 0x4c5   :  { %v704_v22 = vmul.f32 1.442695, %v701_v9 }
 0x4c6   :  { %v375_v62 = vand.u32 2147483647, %v2640_v60  ;;  %v378_v63 = vadd.f32 1.0, %v376_v57  ;;  %v404_v18 = vmul.f32 %v402_v15, %v374_v59  ;;  %vm371_vm11 = vcmp.ge.f32.partialorder %v2640_v60, 0.0 }
 0x4c8   :  { %v377_v0 = vmul.f32 0.3275911, %v375_v62  ;;  %2358 = vrcp.f32 %v378_v63  ;;  %v403_v24 = vsub.f32 0.0, %v375_v62  ;;  %v406_v42 = vmul.f32 1.442695, %v404_v18 }
 0x4ca   :  { %v2355_v1 = vpop.eup %2354  ;;  %v379_v4 = vadd.f32 1.0, %v377_v0  ;;  %v405_v38 = vmul.f32 %v403_v24, %v375_v62 }
 0x4cb   :  { %v680_v6 = vmul.f32 1.0614054, %v2355_v1 }
 0x4cc   :  { %2360 = vrcp.f32 %v379_v4  ;;  %v408_v51 = vmul.f32 1.442695, %v405_v38 }
 0x4cd   :  { %v682_v7 = vadd.f32 -1.4531521, %v680_v6  ;;  %2362 = vpow2.f32 %v702_v11 }
 0x4ce   :  { %v2357_v8 = vpop.eup %2356  ;;  %2364 = vpow2.f32 %v704_v22 }
 0x4cf   :  { %v684_v13 = vmul.f32 %v2355_v1, %v682_v7  ;;  %v681_v14 = vmul.f32 1.0614054, %v2357_v8  ;;  %2366 = vpow2.f32 %v406_v42  ;;  %v2443_v7 = vmov -1.0  }
 0x4d0   :  { %2368 = vpow2.f32 %v408_v51  ;;  %v668_v9 = vsel %vm666_vm8, 1.0, %v2443_v7  ;;  %v669_v24 = vsel %vm667_vm9, 1.0, %v2443_v7  ;;  %v367_v51 = vmul.f32 0.5, %v2636_v58 }
 0x4d1   :  { %v686_v17 = vadd.f32 1.4214138, %v684_v13  ;;  %v683_v20 = vadd.f32 -1.4531521, %v681_v14 }
 0x4d2   :  { %v2359_v27 = vpop.eup %2358 }
 0x4d3   :  { %v688_v28 = vmul.f32 %v2355_v1, %v686_v17  ;;  %v685_v16 = vmul.f32 %v2357_v8, %v683_v20  ;;  %v384_v21 = vmul.f32 1.0614054, %v2359_v27 }
 0x4d5   :  { %v690_v29 = vadd.f32 -0.28449672, %v688_v28  ;;  %v687_v30 = vadd.f32 1.4214138, %v685_v16  ;;  %v386_v36 = vadd.f32 -1.4531521, %v384_v21 }
 0x4d6   :  { %v2361_v32 = vpop.eup %2360  ;;  %v120_v21 = vld [vmem:[%s2867_s4 + $0xd0] sm:$0xff] }
 0x4d7   :  { %v692_v39 = vmul.f32 %v2355_v1, %v690_v29  ;;  %v689_v40 = vmul.f32 %v2357_v8, %v687_v30  ;;  %v385_v44 = vmul.f32 1.0614054, %v2361_v32  ;;  %v388_v46 = vmul.f32 %v2359_v27, %v386_v36  ;;  %v2363_v59 = vpop.eup %2362 }
 0x4d8   :  { %v2365_v6 = vpop.eup %2364  ;;  %v663_v30 = vmul.f32 0.5, %v2620_v41 }
 0x4d9   :  { %v694_v47 = vadd.f32 0.2548296, %v692_v39  ;;  %v691_v48 = vadd.f32 -0.28449672, %v689_v40  ;;  %v387_v49 = vadd.f32 -1.4531521, %v385_v44  ;;  %v2367_v28 = vpop.eup %2366  ;;  %v2240_v39 = vpack.c.bf16 %v121_v45, %v120_v21 }
 0x4da   :  { %v390_v50 = vadd.f32 1.4214138, %v388_v46  ;;  %v2369_v38 = vpop.eup %2368  ;;  %v372_v44 = vsel %vm370_vm10, 1.0, %v2443_v7 }
 0x4db   :  { %v696_v53 = vmul.f32 %v2355_v1, %v694_v47  ;;  %v693_v54 = vmul.f32 %v2357_v8, %v691_v48  ;;  %v389_v56 = vmul.f32 %v2361_v32, %v387_v49  ;;  %v366_v48 = vmul.f32 0.5, %v2631_v52 }
 0x4dc   :  { %v392_v57 = vmul.f32 %v2359_v27, %v390_v50  ;;  %v878_v52 = vrot.slane %v2509_v12, 2 }
 0x4dd   :  { %v706_v61 = vmul.f32 %v2363_v59, %v696_v53  ;;  %v695_v62 = vadd.f32 0.2548296, %v693_v54  ;;  %v391_v63 = vadd.f32 1.4214138, %v389_v56 }
 0x4de   :  { %v394_v0 = vadd.f32 -0.28449672, %v392_v57 }
 0x4df   :  { %v708_v2 = vsub.f32 1.0, %v706_v61  ;;  %v697_v3 = vmul.f32 %v2357_v8, %v695_v62  ;;  %v393_v4 = vmul.f32 %v2361_v32, %v391_v63 }
 0x4e0   :  { %v396_v1 = vmul.f32 %v2359_v27, %v394_v0 }
 0x4e1   :  { %v710_v11 = vmul.f32 %v708_v2, %v668_v9  ;;  %v707_v13 = vmul.f32 %v2365_v6, %v697_v3  ;;  %v395_v14 = vadd.f32 -0.28449672, %v393_v4 }
 0x4e2   :  { %v398_v15 = vadd.f32 0.2548296, %v396_v1 }
 0x4e3   :  { %v712_v17 = vadd.f32 1.0, %v710_v11  ;;  %v709_v20 = vsub.f32 1.0, %v707_v13  ;;  %v397_v22 = vmul.f32 %v2361_v32, %v395_v14 }
 0x4e4   :  { %v400_v8 = vmul.f32 %v2359_v27, %v398_v15 }
 0x4e5   :  { %v714_v16 = vmul.f32 %v712_v17, %v662_v37  ;;  %v711_v18 = vmul.f32 %v709_v20, %v669_v24  ;;  %v399_v29 = vadd.f32 0.2548296, %v397_v22 }
 0x4e6   :  { %v410_v34 = vmul.f32 %v2367_v28, %v400_v8 }
 0x4e7   :  { %2107 = vmatprep.mubr.msk.f32.mxu0 %vm36_vm0, %v714_v16  ;;  %v713_v27 = vadd.f32 1.0, %v711_v18  ;;  %v401_v36 = vmul.f32 %v2361_v32, %v399_v29  ;;  %v373_v32 = vsel %vm371_vm11, 1.0, %v2443_v7 }
 0x4e8   :  { %v412_v40 = vsub.f32 1.0, %v410_v34 }
 0x4e9   :  { %v715_v42 = vmul.f32 %v713_v27, %v663_v30  ;;  %v411_v46 = vmul.f32 %v2369_v38, %v401_v36 }
 0x4ea   :  { %v414_v47 = vmul.f32 %v412_v40, %v372_v44 }
 0x4eb   :  { %2108 = vmatmul.mubr.msk.f32.vlgmr.msra.gmra.mrb[6].mxu0 %vm36_vm0, %v715_v42  ;;  %v413_v55 = vsub.f32 1.0, %v411_v46 }
 0x4ec   :  { %2239 = vmatpush3.bf16.msra.mxu0 %v2599_v5  ;;  %v416_v41 = vadd.f32 1.0, %v414_v47 }
 0x4ed   :  { %2241 = vmatprep.subr.bf16.mxu0 %v2240_v39  ;;  %v415_v49 = vmul.f32 %v413_v55, %v373_v32  ;;  %v1174_v32 = vld [vmem:[%s2867_s4 + $0x60] sm:$0xff] }
 0x4ee   :  { %v418_v50 = vmul.f32 %v416_v41, %v366_v48 }
 0x4ef   :  { %v417_v53 = vadd.f32 1.0, %v415_v49  ;;  %v1175_v49 = vld [vmem:[%s2867_s4 + $0x68] sm:$0xff] }
 0x4f0   :  { %2243 = vmatpush3.bf16.msra.mxu0 %v2240_v39  ;;  %2118 = vmatprep.mubr.msk.f32.mxu0 %vm36_vm0, %v418_v50  ;;  %v1176_v50 = vld [vmem:[%s2867_s4 + $0x70] sm:$0xff] }
 0x4f1   :  { %v419_v60 = vmul.f32 %v417_v53, %v367_v51  ;;  %v2252_v51 = vpack.c.bf16 %v1175_v49, %v1174_v32  ;;  %v1177_v53 = vld [vmem:[%s2867_s4 + $0x78] sm:$0xff] }
 0x4f3   :  { %2119 = vmatmul.mubr.msk.f32.vlgmr.msra.gmra.mrb[6].mxu0 %vm36_vm0, %v419_v60  ;;  %v2256_v60 = vpack.c.bf16 %v1177_v53, %v1176_v50 }
 0x5c6   :  { %v2120_v54 = vpop.f32.mrb[6].mxu0 }
 0x5c7   :  { %962 = vperm.xlu1 %2324, %v2120_v54   ;;  %v869_v5 = vpop.f32.mrb[7].mxu0 }
 0x5c8   :  { %v2245_v56 = vpack.c.bf16 %v2120_v54, %v869_v5  ;;  %958 = vperm.xlu0 %2323, %v869_v5  }
 0x5ca   :  { %2247 = vmatpush3.bf16.xpose.msk.msra.mxu1 %vm2499_vm1, %v2245_v56 }
 0x5cb   :  { %2249 = vmatprep.subr.bf16.mxu1 %v2245_v56 }
 0x5d1   :  { %2126 = vmatmul.mubr.msk.f32.vlgmr.msra.gmra.mrb[4].mxu1 %vm36_vm0, %v878_v52 }
 0x5d2   :  { %2251 = vmatpush3.bf16.msra.mxu1 %v2245_v56 }
 0x5d3   :  { %2253 = vmatprep.subr.bf16.mxu1 %v2252_v51 }
 0x646   :  { %v963_v61 = vpop.permute.xlu1 %962 }
 0x647   :  { %v959_v62 = vpop.permute.xlu0 %958 }
 0x6a4   :  { %v953_v58 = vpop.f32.mrb[4].mxu1 }
 0x6a5   :  { %v968_v59 = vrot.slane %v953_v58, %v2535_v26  ;;  %v2127_v57 = vpop.f32.mrb[5].mxu1 }
 0x6a6   :  { %v1110_v57 = vsub.s32 7, %v2532_v25 }
 0x6a7   :  { %v969_v63 = vadd.f32 %v968_v59, %v959_v62  ;;  %v970_v0 = vadd.f32 %v968_v59, %v963_v61  ;;  %v2699_v61 = vld [vmem:[%s2867_s4 + $0x108] sm:$0xff] }
 0x6a8   :  { %v1111_v62 = vrot.slane %v2509_v12, %v1110_v57 }
 0x6a9   :  { %v973_v2 = vmul.f32 0.02, %v969_v63  ;;  %v974_v3 = vmul.f32 0.02, %v970_v0  ;;  %vm972_vm12 = vcmp.gt.f32.partialorder %v970_v0, 0.0  ;;  %vm971_vm13 = vcmp.gt.f32.partialorder %v969_v63, 0.0 }
 0x6ab   :  { %v976_v4 = vsel %vm972_vm12, %v970_v0, %v974_v3  ;;  %v975_v6 = vsel %vm971_vm13, %v969_v63, %v973_v2  ;;  %v1117_v3 = vrot.slane %v2699_v61, %v2535_v26 }
 0x6ac   :  { %v978_v9 = vadd.f32 %v976_v4, %v2548_v43  ;;  %v977_v1 = vadd.f32 %v975_v6, %v2542_v33 }
 0x6ae   :  { %v982_v11 = vsel %vm223_vm5, %v978_v9, -inf  ;;  %v979_v13 = vsel %vm223_vm5, %v977_v1, -inf }
 0x6af   :  { %983 = vmax.xlane.f32.xlu0 %v982_v11  ;;  %980 = vmax.xlane.f32.xlu1 %v979_v13 }
 0x73c   :  { %v984_v14 = vpop.xlane.xlu0 %983  ;;  %v981_v15 = vpop.xlane.xlu1 %980 }
 0x73d   :  { %v986_v37 = vsub.f32 %v978_v9, %v984_v14  ;;  %v985_v17 = vsub.f32 %v977_v1, %v981_v15 }
 0x73f   :  { %v989_v20 = vmul.f32 1.442695, %v986_v37  ;;  %v987_v22 = vmul.f32 1.442695, %v985_v17 }
 0x741   :  { %2370 = vpow2.f32 %v989_v20 }
 0x742   :  { %2372 = vpow2.f32 %v987_v22 }
 0x74b   :  { %v2371_v24 = vpop.eup %2370 }
 0x74c   :  { %v2373_v8 = vpop.eup %2372  ;;  %v994_v43 = vsel %vm223_vm5, %v2371_v24, 0.0 }
 0x74d   :  { %995 = vadd.xlane.f32.xlu1 %v994_v43  ;;  %v991_v33 = vsel %vm223_vm5, %v2373_v8, 0.0 }
 0x74e   :  { %992 = vadd.xlane.f32.xlu0 %v991_v33 }
 0x7da   :  { %v996_v28 = vpop.xlane.xlu1 %995 }
 0x7db   :  { %v993_v16 = vpop.xlane.xlu0 %992  ;;  %2374 = vrcp.f32 %v996_v28 }
 0x7dc   :  { %2376 = vrcp.f32 %v993_v16 }
 0x7e5   :  { %v2375_v18 = vpop.eup %2374 }
 0x7e6   :  { %v2377_v21 = vpop.eup %2376  ;;  %v1000_v45 = vmul.f32 %v2375_v18, %v2371_v24 }
 0x7e7   :  { %v999_v29 = vmul.f32 %v2377_v21, %v2373_v8 }
 0x7e9   :  { %2132 = vmatprep.mubr.msk.f32.mxu1 %vm223_vm5, %v999_v29 }
 0x7ea   :  { %2133 = vmatmul.mubr.msk.f32.vlgmr.msra.gmra.mrb[6].mxu1 %vm223_vm5, %v1000_v45 }
 0x7eb   :  { %2255 = vmatpush3.bf16.msra.mxu1 %v2252_v51 }
 0x7ec   :  { %2257 = vmatprep.subr.bf16.mxu1 %v2256_v60 }
 0x7ef   :  { %2259 = vmatpush3.bf16.msra.mxu1 %v2256_v60 }
 0x8bd   :  { %v2134_v34 = vpop.f32.mrb[6].mxu1 }
 0x8be   :  { %v1073_v30 = vpop.f32.mrb[7].mxu1  ;;  %v1085_v27 = vsel %vm36_vm0, %v2134_v34, 0.0 }
 0x8bf   :  { %1086 = vadd.xlane.f32.xlu1 %v1085_v27  ;;  %v1082_v36 = vsel %vm36_vm0, %v1073_v30, 0.0 }
 0x8c0   :  { %1083 = vadd.xlane.f32.xlu0 %v1082_v36 }
 0x94c   :  { %v1087_v38 = vpop.xlane.xlu1 %1086 }
 0x94d   :  { %v1089_v39 = vmul.f32 0.03125, %v1087_v38  ;;  %v1084_v40 = vpop.xlane.xlu0 %1083 }
 0x94e   :  { %v1088_v42 = vmul.f32 0.03125, %v1084_v40 }
 0x94f   :  { %v1091_v44 = vsub.f32 %v2134_v34, %v1089_v39 }
 0x950   :  { %v1090_v46 = vsub.f32 %v1073_v30, %v1088_v42 }
 0x951   :  { %v1093_v47 = vmul.f32 %v1091_v44, %v1091_v44 }
 0x952   :  { %v1092_v55 = vmul.f32 %v1090_v46, %v1090_v46 }
 0x953   :  { %v1097_v48 = vsel %vm36_vm0, %v1093_v47, 0.0 }
 0x954   :  { %1098 = vadd.xlane.f32.xlu1 %v1097_v48  ;;  %v1094_v41 = vsel %vm36_vm0, %v1092_v55, 0.0 }
 0x955   :  { %1095 = vadd.xlane.f32.xlu0 %v1094_v41 }
 0x9e1   :  { %v1099_v54 = vpop.xlane.xlu1 %1098 }
 0x9e2   :  { %v1101_v5 = vmul.f32 0.03125, %v1099_v54  ;;  %v1096_v56 = vpop.xlane.xlu0 %1095 }
 0x9e3   :  { %v1100_v52 = vmul.f32 0.03125, %v1096_v56 }
 0x9e4   :  { %v1103_v58 = vadd.f32 1e-05, %v1101_v5 }
 0x9e5   :  { %v1102_v59 = vadd.f32 1e-05, %v1100_v52 }
 0x9e6   :  { %2378 = vrsqrt.f32 %v1103_v58 }
 0x9e7   :  { %2380 = vrsqrt.f32 %v1102_v59 }
 0x9f0   :  { %v2379_v63 = vpop.eup %2378 }
 0x9f1   :  { %v2381_v0 = vpop.eup %2380  ;;  %v1107_v2 = vmul.f32 %v2379_v63, %v1091_v44 }
 0x9f2   :  { %v1106_v4 = vmul.f32 %v2381_v0, %v1090_v46 }
 0x9f3   :  { %v1113_v6 = vmul.f32 %v1111_v62, %v1107_v2 }
 0x9f4   :  { %v1112_v9 = vmul.f32 %v1111_v62, %v1106_v4  ;;  %v1180_v4 = vsub.s32 1, %v2532_v25 }
 0x9f5   :  { %v1119_v1 = vadd.f32 %v1117_v3, %v1113_v6 }
 0x9f6   :  { %v1118_v11 = vadd.f32 %v1117_v3, %v1112_v9  ;;  %v1181_v6 = vrot.slane %v2699_v61, %v1180_v4 }
 0x9f7   :  { %v1123_v13 = vmul.f32 0.70710677, %v1119_v1  ;;  %v1121_v0 = vmul.f32 0.5, %v1119_v1  ;;  %v2411_v1 = vld [vmem:[%s2863_s0] sm:$0xff] }
 0x9f8   :  { %v1122_v14 = vmul.f32 0.70710677, %v1118_v11  ;;  %v1120_v62 = vmul.f32 0.5, %v1118_v11  ;;  %v2410_v11 = vld [vmem:[%s2863_s0 + $0x8] sm:$0xff] }
 0x9f9   :  { %v1129_v15 = vand.u32 2147483647, %v1123_v13  ;;  %vm1125_vm14 = vcmp.ge.f32.partialorder %v1123_v13, 0.0 }
 0x9fa   :  { %v1128_v37 = vand.u32 2147483647, %v1122_v14  ;;  %vm1124_vm15 = vcmp.ge.f32.partialorder %v1122_v14, 0.0  ;;  %v1127_v5 = vsel %vm1125_vm14, 1.0, %v2443_v7 }
 0x9fb   :  { %v1131_v17 = vmul.f32 0.3275911, %v1129_v15  ;;  %v1157_v12 = vsub.f32 0.0, %v1129_v15  ;;  %v1126_v56 = vsel %vm1124_vm15, 1.0, %v2443_v7 }
 0x9fc   :  { %v1130_v20 = vmul.f32 0.3275911, %v1128_v37  ;;  %v1156_v8 = vsub.f32 0.0, %v1128_v37 }
 0x9fd   :  { %v1133_v22 = vadd.f32 1.0, %v1131_v17  ;;  %v1159_v33 = vmul.f32 %v1157_v12, %v1129_v15 }
 0x9fe   :  { %v1132_v24 = vadd.f32 1.0, %v1130_v20  ;;  %v1158_v28 = vmul.f32 %v1156_v8, %v1128_v37 }
 0x9ff   :  { %2382 = vrcp.f32 %v1133_v22  ;;  %v1162_v29 = vmul.f32 1.442695, %v1159_v33 }
 0xa00   :  { %2384 = vrcp.f32 %v1132_v24  ;;  %v1160_v34 = vmul.f32 1.442695, %v1158_v28 }
 0xa01   :  { %2386 = vpow2.f32 %v1162_v29 }
 0xa02   :  { %2388 = vpow2.f32 %v1160_v34  ;;  %v1396_v34 = vld [vmem:[%s2867_s4 + $0x30] sm:$0xff] }
 0xa09   :  { %v2383_v43 = vpop.eup %2382 }
 0xa0a   :  { %v2385_v26 = vpop.eup %2384  ;;  %v1139_v16 = vmul.f32 1.0614054, %v2383_v43 }
 0xa0b   :  { %v1138_v18 = vmul.f32 1.0614054, %v2385_v26  ;;  %v2387_v32 = vpop.eup %2386 }
 0xa0c   :  { %v1141_v21 = vadd.f32 -1.4531521, %v1139_v16  ;;  %v2389_v50 = vpop.eup %2388 }
 0xa0d   :  { %v1140_v45 = vadd.f32 -1.4531521, %v1138_v18 }
 0xa0e   :  { %v1143_v30 = vmul.f32 %v2383_v43, %v1141_v21  ;;  %v1394_v21 = vld [vmem:[%s2867_s4 + $0x20] sm:$0xff] }
 0xa0f   :  { %v1142_v27 = vmul.f32 %v2385_v26, %v1140_v45  ;;  %v1395_v45 = vld [vmem:[%s2867_s4 + $0x28] sm:$0xff] }
 0xa10   :  { %v1145_v36 = vadd.f32 1.4214138, %v1143_v30  ;;  %v2268_v29 = vpack.c.bf16 %v1395_v45, %v1394_v21  ;;  %v1397_v30 = vld [vmem:[%s2867_s4 + $0x38] sm:$0xff] }
 0xa11   :  { %v1144_v38 = vadd.f32 1.4214138, %v1142_v27  ;;  %v2272_v27 = vpack.c.bf16 %v1397_v30, %v1396_v34  ;;  %v1693_v30 = vld [vmem:[%s2867_s4 + $0x80] sm:$0xff] }
 0xa12   :  { %v1147_v39 = vmul.f32 %v2383_v43, %v1145_v36  ;;  %2269 = vmatprep.subr.bf16.mxu1 %v2268_v29  ;;  %v1303_v36 = vld [vmem:[%s2867_s4 + $0x40] sm:$0xff] }
 0xa13   :  { %v1146_v40 = vmul.f32 %v2385_v26, %v1144_v38  ;;  %v1304_v38 = vld [vmem:[%s2867_s4 + $0x48] sm:$0xff] }
 0xa14   :  { %v1149_v42 = vadd.f32 -0.28449672, %v1147_v39  ;;  %v2260_v39 = vpack.c.bf16 %v1304_v38, %v1303_v36  ;;  %v1695_v36 = vld [vmem:[%s2867_s4 + $0x90] sm:$0xff] }
 0xa15   :  { %v1148_v44 = vadd.f32 -0.28449672, %v1146_v40  ;;  %v1305_v40 = vld [vmem:[%s2867_s4 + $0x50] sm:$0xff] }
 0xa16   :  { %v1151_v46 = vmul.f32 %v2383_v43, %v1149_v42  ;;  %v1306_v42 = vld [vmem:[%s2867_s4 + $0x58] sm:$0xff]  ;;  %2261 = vmatprep.subr.bf16.mxu0 %v2260_v39 }
 0xa17   :  { %v1150_v47 = vmul.f32 %v2385_v26, %v1148_v44  ;;  %v2749_v44 = vld [vmem:[%s2865_s2] sm:$0xff]  ;;  %2263 = vmatpush3.bf16.msra.mxu0 %v2260_v39  ;;  %v1696_v39 = vld [vmem:[%s2867_s4 + $0x98] sm:$0xff] }
 0xa18   :  { %v1153_v55 = vadd.f32 0.2548296, %v1151_v46  ;;  %v2264_v46 = vpack.c.bf16 %v1306_v42, %v1305_v40  ;;  %2154 = vmatprep.mubr.msk.f32.mxu0 %vm36_vm0, %v2749_v44  ;;  %v2290_v40 = vpack.c.bf16 %v1696_v39, %v1695_v36 }
 0xa19   :  { %v1152_v48 = vadd.f32 0.2548296, %v1150_v47  ;;  %v2756_v47 = vld [vmem:[%s2865_s2 + $0x8] sm:$0xff] }
 0xa1a   :  { %v1155_v41 = vmul.f32 %v2383_v43, %v1153_v55  ;;  %2265 = vmatprep.subr.bf16.mxu0 %v2264_v46 }
 0xa1b   :  { %v1154_v49 = vmul.f32 %v2385_v26, %v1152_v48  ;;  %2267 = vmatpush3.bf16.msra.mxu0 %v2264_v46 }
 0xa1c   :  { %v1165_v51 = vmul.f32 %v2387_v32, %v1155_v41 }
 0xa1d   :  { %v1164_v53 = vmul.f32 %v2389_v50, %v1154_v49 }
 0xa1e   :  { %v1167_v60 = vsub.f32 1.0, %v1165_v51  ;;  %2155 = vmatmul.mubr.msk.f32.vlgmr.msra.gmra.mrb[8].mxu0 %vm36_vm0, %v2756_v47  ;;  %v1293_v51 = vsub.s32 2, %v2532_v25  ;;  %v1982_v25 = vld [vmem:[%s2867_s4 + $0x110] ss:$0 sm:$0xff] }
 0xa1f   :  { %v1166_v54 = vsub.f32 1.0, %v1164_v53 }
 0xa20   :  { %v1169_v52 = vmul.f32 %v1167_v60, %v1127_v5  ;;  %v1294_v53 = vrot.slane %v2699_v61, %v1293_v51 }
 0xa21   :  { %v1168_v58 = vmul.f32 %v1166_v54, %v1126_v56 }
 0xa22   :  { %v1171_v59 = vadd.f32 1.0, %v1169_v52  ;;  %v1300_v52 = vrot.slane %v2699_v61, %v356_v31 }
 0xa23   :  { %v1170_v63 = vadd.f32 1.0, %v1168_v58 }
 0xa24   :  { %v1173_v3 = vmul.f32 %v1171_v59, %v1121_v0  ;;  %v1391_v0 = vrot.slane %v2699_v61, %v362_v35  ;;  %v28_v35 = vld [vmem:[%s2866_s3 + $0x8] sm:$0xff] }
 0xa25   :  { %v1172_v2 = vmul.f32 %v1170_v63, %v1120_v62 }
 0xa27   :  { %2143 = vmatprep.mubr.msk.f32.mxu1 %vm36_vm0, %v1172_v2 }
 0xa28   :  { %2144 = vmatmul.mubr.msk.f32.vlgmr.msra.gmra.mrb[8].mxu1 %vm36_vm0, %v1173_v3 }
 0xa29   :  { %2271 = vmatpush3.bf16.msra.mxu1 %v2268_v29 }
 0xa2a   :  { %2273 = vmatprep.subr.bf16.mxu1 %v2272_v27 }
 0xa2d   :  { %2275 = vmatpush3.bf16.msra.mxu1 %v2272_v27  ;;  %v1694_v27 = vld [vmem:[%s2867_s4 + $0x88] sm:$0xff] }
 0xa2e   :  { %v2286_v38 = vpack.c.bf16 %v1694_v27, %v1693_v30 }
 0xaf1   :  { %v2770_v2 = vpop.f32.mrb[8].mxu0 }
 0xaf2   :  { %v1393_v3 = vadd.f32 %v2770_v2, %v1391_v0  ;;  %v2773_v4 = vpop.f32.mrb[9].mxu0 }
 0xaf3   :  { %v1392_v31 = vadd.f32 %v1391_v0, %v2773_v4 }
 0xaf5   :  { %2172 = vmatprep.mubr.msk.f32.mxu0 %vm36_vm0, %v1392_v31 }
 0xafb   :  { %v2145_v9 = vpop.f32.mrb[8].mxu1 }
 0xafc   :  { %v1260_v13 = vadd.f32 %v2145_v9, %v1181_v6  ;;  %v1254_v14 = vpop.f32.mrb[9].mxu1 }
 0xafd   :  { %v1255_v7 = vadd.f32 %v1254_v14, %v1181_v6  ;;  %v1482_v6 = vrot.slane %v2699_v61, %v652_v19  ;;  %v27_v19 = vld [vmem:[%s2866_s3] sm:$0xff] }
 0xafe   :  { %v1264_v15 = vadd.f32 %v2410_v11, %v1260_v13 }
 0xaff   :  { %v1263_v37 = vadd.f32 %v2411_v1, %v1255_v7 }
 0xb00   :  { %v1268_v17 = vsel %vm36_vm0, %v1264_v15, 0.0 }
 0xb01   :  { %1269 = vadd.xlane.f32.xlu1 %v1268_v17  ;;  %v1265_v20 = vsel %vm36_vm0, %v1263_v37, 0.0 }
 0xb02   :  { %1266 = vadd.xlane.f32.xlu0 %v1265_v20 }
 0xb8e   :  { %v1270_v22 = vpop.xlane.xlu1 %1269 }
 0xb8f   :  { %v1272_v24 = vmul.f32 0.03125, %v1270_v22  ;;  %v1267_v12 = vpop.xlane.xlu0 %1266  ;;  %v1488_v22 = vrot.slane %v2699_v61, %v658_v23 }
 0xb90   :  { %v1271_v8 = vmul.f32 0.03125, %v1267_v12 }
 0xb91   :  { %v1274_v43 = vsub.f32 %v1264_v15, %v1272_v24 }
 0xb92   :  { %v1273_v33 = vsub.f32 %v1263_v37, %v1271_v8 }
 0xb93   :  { %v1276_v26 = vmul.f32 %v1274_v43, %v1274_v43 }
 0xb94   :  { %v1275_v28 = vmul.f32 %v1273_v33, %v1273_v33 }
 0xb95   :  { %v1280_v16 = vsel %vm36_vm0, %v1276_v26, 0.0 }
 0xb96   :  { %1281 = vadd.xlane.f32.xlu1 %v1280_v16  ;;  %v1277_v18 = vsel %vm36_vm0, %v1275_v28, 0.0 }
 0xb97   :  { %1278 = vadd.xlane.f32.xlu0 %v1277_v18 }
 0xc23   :  { %v1282_v55 = vpop.xlane.xlu1 %1281 }
 0xc24   :  { %v1284_v48 = vmul.f32 0.03125, %v1282_v55  ;;  %v1279_v41 = vpop.xlane.xlu0 %1278 }
 0xc25   :  { %v1283_v32 = vmul.f32 0.03125, %v1279_v41 }
 0xc26   :  { %v1286_v49 = vadd.f32 1e-05, %v1284_v48 }
 0xc27   :  { %v1285_v50 = vadd.f32 1e-05, %v1283_v32 }
 0xc28   :  { %2390 = vrsqrt.f32 %v1286_v49 }
 0xc29   :  { %2392 = vrsqrt.f32 %v1285_v50 }
 0xc32   :  { %v2391_v60 = vpop.eup %2390 }
 0xc33   :  { %v2393_v54 = vpop.eup %2392  ;;  %v1290_v5 = vmul.f32 %v2391_v60, %v1274_v43  ;;  %v1782_v60 = vld [vmem:[%s2867_s4 + $0xa0] sm:$0xff] }
 0xc34   :  { %v1289_v56 = vmul.f32 %v2393_v54, %v1273_v33  ;;  %v1783_v54 = vld [vmem:[%s2867_s4 + $0xa8] sm:$0xff] }
 0xc35   :  { %v1296_v58 = vmul.f32 %v1294_v53, %v1290_v5  ;;  %v2294_v5 = vpack.c.bf16 %v1783_v54, %v1782_v60 }
 0xc36   :  { %v1295_v59 = vmul.f32 %v1294_v53, %v1289_v56 }
 0xc37   :  { %v1302_v63 = vadd.f32 %v1300_v52, %v1296_v58  ;;  %v1784_v58 = vld [vmem:[%s2867_s4 + $0xb0] sm:$0xff] }
 0xc38   :  { %v1301_v62 = vadd.f32 %v1300_v52, %v1295_v59  ;;  %v1785_v59 = vld [vmem:[%s2867_s4 + $0xb8] sm:$0xff]  ;;  %s2445_s4 = smov [#allocation2]  }
 0xc39   :  { %s1934_s30 = sshll.u32 %s2445_s4, 4  ;;  %s1935_s30 = int_to_ptr.vmem [resolvable:$true] %s1934_s30 }
 0xc3a   :  { %2165 = vmatprep.mubr.msk.f32.mxu1 %vm36_vm0, %v1301_v62  ;;  %v2298_v62 = vpack.c.bf16 %v1785_v59, %v1784_v58  ;;  %s2412_s6 = scalar_lea.vmem %s1935_s30, 256  ;;  %p2417_p1 = scmp.lt.s32.totalorder %s1935_s30, %s1935_s30 }
 0xc3b   :  { %2166 = vmatmul.mubr.msk.f32.vlgmr.msra.gmra.mrb[10].mxu1 %vm36_vm0, %v1302_v63  ;;  %v1700_v63 = vrot.slane %v2699_v61, %v1110_v57  ;;  %p2413_p0 = scmp.ne.s32.totalorder %s1935_s30, %s2412_s6  ;;  %p2418_p2 = scmp.lt.s32.totalorder %s2412_s6, %s2412_s6 }
 0xc3d   :  { %p2419_p3 = por %p2418_p2, %p2417_p1 }
 0xc3f   :  { %p2420_p4 = pnand %p2419_p3, %p2413_p0 }
 0xd0e   :  { %v2167_v9 = vpop.f32.mrb[10].mxu1 }
 0xd0f   :  { %v1484_v13 = vadd.f32 %v2167_v9, %v1482_v6  ;;  %v1470_v14 = vpop.f32.mrb[11].mxu1 }
 0xd10   :  { %v1483_v7 = vadd.f32 %v1482_v6, %v1470_v14 }
 0xd12   :  { %v2276_v11 = vpack.c.bf16 %v1484_v13, %v1483_v7 }
 0xd14   :  { %2278 = vmatprep.subr.msk.bf16.mxu0 %vm2499_vm1, %v2276_v11 }
 0xd15   :  { %2281 = vmatpush3.bf16.xpose.msk.msra.mxu0 %vm2499_vm1, %v2276_v11 }
 0xd16   :  { %2287 = vmatprep.subr.bf16.mxu0 %v2286_v38 }
 0xd1c   :  { %2173 = vmatmul.mubr.msk.f32.vlgmr.msra.gmra.mrb[10].mxu0 %vm36_vm0, %v1393_v3 }
 0xd1d   :  { %2289 = vmatpush3.bf16.msra.mxu0 %v2286_v38 }
 0xd1e   :  { %2291 = vmatprep.subr.bf16.mxu0 %v2290_v40 }
 0xd21   :  { %2293 = vmatpush3.bf16.msra.mxu0 %v2290_v40 }
 0xdef   :  { %v2174_v15 = vpop.f32.mrb[10].mxu0 }
 0xdf0   :  { %v1579_v1 = vadd.f32 %v2174_v15, %v28_v35  ;;  %v1573_v37 = vpop.f32.mrb[11].mxu0 }
 0xdf1   :  { %v1574_v17 = vadd.f32 %v1573_v37, %v27_v19 }
 0xdf2   :  { %v1585_v20 = vsel %vm223_vm5, %v1579_v1, -inf }
 0xdf3   :  { %1586 = vmax.xlane.f32.xlu1 %v1585_v20  ;;  %v1582_v10 = vsel %vm223_vm5, %v1574_v17, -inf }
 0xdf4   :  { %1583 = vmax.xlane.f32.xlu0 %v1582_v10 }
 0xe0a   :  { %1490 = vrot.lane.b32.xlu0 %v1488_v22, %s2444_s13 }
 0xe80   :  { %v1587_v24 = vpop.xlane.xlu1 %1586 }
 0xe81   :  { %v1589_v12 = vsub.f32 %v1579_v1, %v1587_v24  ;;  %v1584_v8 = vpop.xlane.xlu0 %1583 }
 0xe82   :  { %v1588_v43 = vsub.f32 %v1574_v17, %v1584_v8 }
 0xe83   :  { %v1592_v33 = vmul.f32 1.442695, %v1589_v12 }
 0xe84   :  { %v1590_v26 = vmul.f32 1.442695, %v1588_v43 }
 0xe85   :  { %2394 = vpow2.f32 %v1592_v33  ;;  %v1491_v28 = vpop.permute.xlu0 %1490 }
 0xe86   :  { %v1493_v16 = vadd.f32 %v1491_v28, %v1470_v14  ;;  %v1494_v18 = vadd.f32 %v2167_v9, %v1491_v28  ;;  %2396 = vpow2.f32 %v1590_v26 }
 0xe88   :  { %v2325_v21 = vpack.i.bf16 %v1494_v18, %v1493_v16 }
 0xe8f   :  { %v2395_v45 = vpop.eup %2394 }
 0xe90   :  { %v1597_v29 = vsel %vm223_vm5, %v2395_v45, 0.0  ;;  %v2397_v34 = vpop.eup %2396 }
 0xe91   :  { %1598 = vadd.xlane.f32.xlu1 %v1597_v29  ;;  %v1594_v23 = vsel %vm223_vm5, %v2397_v34, 0.0 }
 0xe95   :  { %1595 = vadd.xlane.f32.xlu1 %v1594_v23 }
 0xea6   :  { %2326 = vrot.lane.b32.xlu1 %v2325_v21, %s2441_s1 }
 0xf1e   :  { %v1599_v42 = vpop.xlane.xlu1 %1598 }
 0xf1f   :  { %2398 = vrcp.f32 %v1599_v42 }
 0xf22   :  { %v1596_v46 = vpop.xlane.xlu1 %1595 }
 0xf23   :  { %2400 = vrcp.f32 %v1596_v46 }
 0xf26   :  { %v2327_v55 = vpop.permute.xlu1 %2326 }
 0xf27   :  { %v2329_v48 = vunpack.i.h.bf16 %v2327_v55  ;;  %v2328_v41 = vunpack.i.l.bf16 %v2327_v55 }
 0xf29   :  { %v2282_v32 = vpack.c.bf16 %v2329_v48, %v2328_v41  ;;  %v2399_v49 = vpop.eup %2398 }
 0xf2a   :  { %v1603_v53 = vmul.f32 %v2399_v49, %v2395_v45 }
 0xf2b   :  { %2283 = vmatprep.subr.bf16.mxu1 %v2282_v32 }
 0xf2c   :  { %2285 = vmatpush3.bf16.msra.mxu1 %v2282_v32 }
 0xf2d   :  { %v2401_v50 = vpop.eup %2400  ;;  %2295 = vmatprep.subr.bf16.mxu1 %v2294_v5 }
 0xf2e   :  { %v1602_v51 = vmul.f32 %v2401_v50, %v2397_v34 }
 0xf30   :  { %2179 = vmatprep.mubr.msk.f32.mxu1 %vm223_vm5, %v1602_v51 }
 0xf31   :  { %2180 = vmatmul.mubr.msk.f32.vlgmr.msra.gmra.mrb[12].mxu1 %vm223_vm5, %v1603_v53 }
 0xf32   :  { %2297 = vmatpush3.bf16.msra.mxu1 %v2294_v5 }
 0xf33   :  { %2299 = vmatprep.subr.bf16.mxu1 %v2298_v62 }
 0xf36   :  { %2301 = vmatpush3.bf16.msra.mxu1 %v2298_v62 }
0x1004   :  { %v2181_v56 = vpop.f32.mrb[12].mxu1 }
0x1005   :  { %v1684_v52 = vpop.f32.mrb[13].mxu1 }
0x1006   :  { %2190 = vmatprep.mubr.msk.f32.mxu0 %vm36_vm0, %v1684_v52 }
0x1007   :  { %2191 = vmatmul.mubr.msk.f32.vlgmr.msra.gmra.mrb[12].mxu0 %vm36_vm0, %v2181_v56 }
0x10da   :  { %v2192_v0 = vpop.f32.mrb[12].mxu0 }
0x10db   :  { %v1773_v3 = vpop.f32.mrb[13].mxu0  ;;  %v1779_v6 = vadd.f32 %v2192_v0, %v1700_v63 }
0x10dc   :  { %v1774_v31 = vadd.f32 %v1773_v3, %v1700_v63 }
0x10de   :  { %2201 = vmatprep.mubr.msk.f32.mxu1 %vm36_vm0, %v1774_v31 }
0x10df   :  { %2202 = vmatmul.mubr.msk.f32.vlgmr.msra.gmra.mrb[14].mxu1 %vm36_vm0, %v1779_v6 }
0x11b2   :  { %v2203_v9 = vpop.f32.mrb[14].mxu1 }
0x11b3   :  { %1871 = vrot.lane.b32.xlu1 %v2203_v9, %s2444_s13  ;;  %v1858_v13 = vpop.f32.mrb[15].mxu1 }
0x11b4   :  { %1869 = vrot.lane.b32.xlu0 %v1858_v13, %s2444_s13 }
0x11b7   :  { %1901 = vrot.lane.b32.xlu1 %v2749_v44, %s2444_s13 }
0x11b8   :  { %1882 = vrot.lane.b32.xlu0 %v1982_v25, %s2444_s13 }
0x11bb   :  { %1909 = vrot.lane.b32.xlu1 %v1774_v31, %s2444_s13 }
0x11bc   :  { %1903 = vrot.lane.b32.xlu0 %v2756_v47, %s2444_s13 }
0x11c0   :  { %1911 = vrot.lane.b32.xlu0 %v1779_v6, %s2444_s13 }
0x1225   :  { %v1872_v57 = vpop.permute.xlu1 %1871 }
0x1226   :  { %v1870_v61 = vpop.permute.xlu0 %1869  ;;  %v1876_v14 = vadd.f32 %v2770_v2, %v1872_v57 }
0x1227   :  { %v1875_v7 = vadd.f32 %v1870_v61, %v2773_v4 }
0x1229   :  { %v1902_v22 = vpop.permute.xlu1 %1901 }
0x122a   :  { %v1883_v11 = vpop.permute.xlu0 %1882 }
0x122b   :  { %v1885_v35 = vadd.f32 %v1883_v11, %v1875_v7  ;;  %v1886_v19 = vadd.f32 %v1883_v11, %v1876_v14 }
0x122d   :  { %v1887_v15 = vsub.f32 0.0, %v1885_v35  ;;  %v1888_v44 = vsub.f32 0.0, %v1886_v19  ;;  %v1910_v8 = vpop.permute.xlu1 %1909 }
0x122e   :  { %v1904_v24 = vpop.permute.xlu0 %1903 }
0x122f   :  { %v1889_v1 = vmul.f32 1.442695, %v1887_v15  ;;  %v1891_v37 = vmul.f32 1.442695, %v1888_v44 }
0x1231   :  { %2402 = vpow2.f32 %v1889_v1 }
0x1232   :  { %2404 = vpow2.f32 %v1891_v37  ;;  %v1912_v28 = vpop.permute.xlu0 %1911 }
0x123b   :  { %v2403_v17 = vpop.eup %2402 }
0x123c   :  { %v2405_v20 = vpop.eup %2404  ;;  %v1893_v47 = vadd.f32 1.0, %v2403_v17 }
0x123d   :  { %v1894_v10 = vadd.f32 1.0, %v2405_v20 }
0x123e   :  { %2406 = vrcp.f32 %v1893_v47 }
0x123f   :  { %2408 = vrcp.f32 %v1894_v10 }
0x1248   :  { %v2407_v2 = vpop.eup %2406 }
0x1249   :  { %v2409_v12 = vpop.eup %2408  ;;  %v1899_v4 = vsub.f32 1.0, %v2407_v2  ;;  %v1915_v26 = vmul.f32 %v2407_v2, %v1910_v8 }
0x124a   :  { %v1900_v43 = vsub.f32 1.0, %v2409_v12  ;;  %v1916_v18 = vmul.f32 %v2409_v12, %v1912_v28 }
0x124b   :  { %v1907_v33 = vmul.f32 %v1902_v22, %v1899_v4 }
0x124c   :  { %v1908_v16 = vmul.f32 %v1904_v24, %v1900_v43 }
0x124d   :  { %v1917_v21 = vadd.f32 %v1915_v26, %v1907_v33 }
0x124e   :  { %v1918_v45 = vadd.f32 %v1916_v18, %v1908_v16 }
0x124f   :  { %1921 = vrot.lane.b32.xlu1 %v1917_v21, %s2441_s1 }
0x1250   :  { %1923 = vrot.lane.b32.xlu0 %v1918_v45, %s2441_s1 }
0x12c1   :  { %v1922_v29 = vpop.permute.xlu1 %1921 }
0x12c2   :  { %1927 = vst.msk [vmem:[#allocation2] sm:$0xff] %vm36_vm0, %v1922_v29  ;;  %v1924_v34 = vpop.permute.xlu0 %1923 }
0x12c3   :  { %1928 = vst.msk [vmem:[#allocation2 + $0x8] sm:$0xff] %vm36_vm0, %v1924_v34 }
0x12c4   :  { %2423 = shalt.err (!%p2420_p4)
}
0x12c5   :  { %s2424_s1 = scalar_lea.hbm %s2868_s5, 256 }
0x12c6   :  { %p2425_p5 = scmp.ne.s32.totalorder %s2868_s5, %s2424_s1  ;;  %p2428_p6 = scmp.lt.u32.totalorder %s2424_s1, %s2868_s5 }
0x12c8   :  { %p2430_p7 = pnand %p2428_p6, %p2425_p5 }
0x12ca   :  { %2433 = shalt.err (!%p2430_p7)
}
0x12cb   :  { %s2446_s12 = smov 128   ;;  %s2447_s13 = smov 8  }
0x12cc   :  { %1940 = dma.vmem_to_hbm [thread:$0]  %s1935_s30, 256, %s2868_s5, [#allocation3], %s2446_s12, %s2446_s12, %s2447_s13  }
0x12cd   :  { %2434 = dma.done.wait [#allocation3], 256  }
0x12ce   :  { %2435 = vsyncadd [#allocation3], 4294967040 }
0x12cf   :  { %1944 = vsyncpa [#allocation3], 1 }

</bundles_post_ra>
